<compile_context>
chip_gen: v7x
topology: tpu7x:2x2x1
jax: 0.10.0
libtpu: 0.0.40
codegen_flags: <defaults>
</compile_context>

<pallas_src>
import functools
import math

import jax
import jax.numpy as jnp
from jax.experimental import pallas as pl
from jax.experimental.pallas import tpu as pltpu

# ----------------- small BERT-like config -----------------
VOCAB = 100
HIDDEN = 32
N_LAYERS = 2
N_HEADS = 4
HEAD_DIM = HIDDEN // N_HEADS
INTERMEDIATE = 64
MAX_POS = 16
TYPE_VOCAB = 2
NUM_LABELS = 3
LN_EPS = 1e-12
INV_SQRT2 = 1.0 / math.sqrt(2.0)


# ----------------- in-kernel helpers (operate on f32 values) -----------------
def _ln(x, g, b):
    mu = jnp.mean(x, axis=-1, keepdims=True)
    var = jnp.mean(jnp.square(x - mu), axis=-1, keepdims=True)
    return (x - mu) * jax.lax.rsqrt(var + LN_EPS) * g + b


def _gelu(x):  # exact (erf) gelu, as in BERT
    return 0.5 * x * (1.0 + jax.lax.erf(x * INV_SQRT2))


def _rep2(shape):
    # whole-array block, re-used (not re-fetched) across grid steps
    return pl.BlockSpec(shape, lambda i: (0, 0))


# ----------------- fused encoder layer kernel (one grid step = one sequence) -----------------
def _encoder_layer_kernel(apply_input_ln,
                          x_ref, mask_ref, emb_g_ref, emb_b_ref,
                          qkv_w_ref, qkv_b_ref,
                          ao_w_ref, ao_b_ref, ao_g_ref, ao_bt_ref,
                          i_w_ref, i_b_ref,
                          o_w_ref, o_b_ref, o_g_ref, o_bt_ref,
                          out_ref):
    H = HIDDEN
    NH = N_HEADS
    Dh = HEAD_DIM
    scale = 1.0 / math.sqrt(Dh)

    x = x_ref[0].astype(jnp.float32)                      # (S, H) current sequence
    if apply_input_ln:                                    # static flag: fused embedding LN (layer 0)
        x = _ln(x, emb_g_ref[...], emb_b_ref[...])

    # additive key mask for this sequence, built once per grid step
    addmask = (1.0 - mask_ref[0]) * -1e9                  # (1, S)

    # ---- fused QKV projection: one wide matmul, bf16 operands / f32 acc ----
    qkv = jnp.dot(x.astype(jnp.bfloat16), qkv_w_ref[...],
                  preferred_element_type=jnp.float32) + qkv_b_ref[...]   # (S, 3H)
    qkv_bf = qkv.astype(jnp.bfloat16)                     # single full-width cast

    # ---- multi-head self-attention, lane-dense merge (no scratch, no masked stores) ----
    # TODO(synk): at production head counts, batch heads via dot_general batch dims
    # (and pack heads to fill the 256x256 MXU) instead of this small static unroll.
    head_ctx = []
    for h in range(NH):
        c0 = h * Dh
        q = qkv_bf[:, c0:c0 + Dh]
        k = qkv_bf[:, H + c0:H + c0 + Dh]
        v = qkv_bf[:, 2 * H + c0:2 * H + c0 + Dh]
        # contract last dims directly (no XLU transpose of K)
        s = jax.lax.dot_general(q, k, (((1,), (1,)), ((), ())),
                                preferred_element_type=jnp.float32) * scale
        s = s + addmask
        s = s - jnp.max(s, axis=-1, keepdims=True)
        p = jnp.exp(s)
        p = p * pl.reciprocal(jnp.sum(p, axis=-1, keepdims=True), approx=True)
        head_ctx.append(jnp.dot(p.astype(jnp.bfloat16), v,
                                preferred_element_type=jnp.float32))
    ctx = jnp.concatenate(head_ctx, axis=-1)              # (S, H) lane-dense merged heads

    # ---- attention output projection + residual + LayerNorm ----
    attn_out = jnp.dot(ctx.astype(jnp.bfloat16), ao_w_ref[...],
                       preferred_element_type=jnp.float32) + ao_b_ref[...]
    h1 = _ln(attn_out + x, ao_g_ref[...], ao_bt_ref[...])

    # ---- FFN (gelu) + residual + LayerNorm ----
    inter = jnp.dot(h1.astype(jnp.bfloat16), i_w_ref[...],
                    preferred_element_type=jnp.float32) + i_b_ref[...]
    inter = _gelu(inter)
    ff = jnp.dot(inter.astype(jnp.bfloat16), o_w_ref[...],
                 preferred_element_type=jnp.float32) + o_b_ref[...]
    y = _ln(ff + h1, o_g_ref[...], o_bt_ref[...])

    # bf16 inter-layer activations: halves HBM traffic between layer kernels
    out_ref[...] = y[None, :, :].astype(out_ref.dtype)


def encoder_layer(x, maskf, emb_g, emb_b, lp, *, apply_input_ln):
    B, S, H = x.shape
    I = lp["i_w"].shape[1]
    # TODO(synk): with constant index_maps the weights could use pipeline_mode=
    # pl.Buffered(1) to skip double-buffering ~14 MB of per-layer weights at BERT-base.
    return pl.pallas_call(
        functools.partial(_encoder_layer_kernel, apply_input_ln),
        grid=(B,),
        in_specs=[
            pl.BlockSpec((1, S, H), lambda b: (b, 0, 0)),     # activations (one sequence)
            pl.BlockSpec((1, 1, S), lambda b: (b, 0, 0)),     # 0/1 attention mask row
            _rep2((1, H)), _rep2((1, H)),                     # fused embedding LN (layer 0)
            _rep2((H, 3 * H)), _rep2((1, 3 * H)),
            _rep2((H, H)), _rep2((1, H)), _rep2((1, H)), _rep2((1, H)),
            _rep2((H, I)), _rep2((1, I)),
            _rep2((I, H)), _rep2((1, H)), _rep2((1, H)), _rep2((1, H)),
        ],
        out_specs=pl.BlockSpec((1, S, H), lambda b: (b, 0, 0)),
        out_shape=jax.ShapeDtypeStruct((B, S, H), jnp.bfloat16),
        compiler_params=pltpu.CompilerParams(
            dimension_semantics=("parallel",),
            vmem_limit_bytes=32 * 1024 * 1024),
    )(x, maskf,
      emb_g.reshape(1, H), emb_b.reshape(1, H),
      lp["qkv_w"], lp["qkv_b"].reshape(1, 3 * H),
      lp["ao_w"], lp["ao_b"].reshape(1, H),
      lp["ao_ln_g"].reshape(1, H), lp["ao_ln_b"].reshape(1, H),
      lp["i_w"], lp["i_b"].reshape(1, I),
      lp["o_w"], lp["o_b"].reshape(1, H),
      lp["o_ln_g"].reshape(1, H), lp["o_ln_b"].reshape(1, H))


# ----------------- fused [CLS]-extract + pooler + classifier + softmax/CE kernel -----------------
def _cls_head_kernel(x_ref, pw_ref, pb_ref, cw_ref, cb_ref, oh_ref,
                     logits_ref, probs_ref, loss_ref):
    xf = x_ref[...].astype(jnp.float32)                   # (B, S, H) last-layer activations
    cls_tok = xf[:, 0, :]                                 # (B, H) [CLS] rows, in-kernel
    pooled = jnp.tanh(jnp.dot(cls_tok.astype(jnp.bfloat16), pw_ref[...],
                              preferred_element_type=jnp.float32) + pb_ref[...])
    logits = jnp.dot(pooled.astype(jnp.bfloat16), cw_ref[...],
                     preferred_element_type=jnp.float32) + cb_ref[...]
    logits_ref[...] = logits
    m = jnp.max(logits, axis=-1, keepdims=True)
    e = jnp.exp(logits - m)
    denom = jnp.sum(e, axis=-1, keepdims=True)
    probs_ref[...] = e / denom                            # exact division: probs sum to 1
    logp = (logits - m) - jnp.log(denom)
    per_ex = -jnp.sum(oh_ref[...] * logp, axis=-1, keepdims=True)   # (B, 1)
    loss_ref[...] = jnp.mean(per_ex, keepdims=True)                 # mean-reduced CE


def cls_head(x, pw, pb, cw, cb, onehot):
    B, S, H = x.shape
    L = cw.shape[1]
    return pl.pallas_call(
        _cls_head_kernel,
        grid=(1,),
        in_specs=[pl.BlockSpec((B, S, H), lambda i: (0, 0, 0)),
                  _rep2((H, H)), _rep2((1, H)),
                  _rep2((H, L)), _rep2((1, L)), _rep2((B, L))],
        out_specs=[_rep2((B, L)), _rep2((B, L)), _rep2((1, 1))],
        out_shape=(jax.ShapeDtypeStruct((B, L), jnp.float32),
                   jax.ShapeDtypeStruct((B, L), jnp.float32),
                   jax.ShapeDtypeStruct((1, 1), jnp.float32)),
    )(x, pw, pb.reshape(1, H), cw, cb.reshape(1, L), onehot)


# ----------------- deterministic parameter init -----------------
def init_params(key):
    keys = iter(jax.random.split(key, 64))

    def nrm(shape, dtype=jnp.float32):
        return (0.02 * jax.random.normal(next(keys), shape, jnp.float32)).astype(dtype)

    p = {
        "word_emb": nrm((VOCAB, HIDDEN)),
        "pos_emb": nrm((MAX_POS, HIDDEN)),
        "type_emb": nrm((TYPE_VOCAB, HIDDEN)),
        "emb_ln_g": jnp.ones((HIDDEN,), jnp.float32),
        "emb_ln_b": jnp.zeros((HIDDEN,), jnp.float32),
        "layers": [],
    }
    for _ in range(N_LAYERS):
        p["layers"].append({
            # fused Q|K|V projection: bf16 weights for the MXU, f32 bias
            "qkv_w": nrm((HIDDEN, 3 * HIDDEN), jnp.bfloat16),
            "qkv_b": jnp.zeros((3 * HIDDEN,), jnp.float32),
            "ao_w": nrm((HIDDEN, HIDDEN), jnp.bfloat16),
            "ao_b": jnp.zeros((HIDDEN,), jnp.float32),
            "ao_ln_g": jnp.ones((HIDDEN,), jnp.float32),
            "ao_ln_b": jnp.zeros((HIDDEN,), jnp.float32),
            "i_w": nrm((HIDDEN, INTERMEDIATE), jnp.bfloat16),
            "i_b": jnp.zeros((INTERMEDIATE,), jnp.float32),
            "o_w": nrm((INTERMEDIATE, HIDDEN), jnp.bfloat16),
            "o_b": jnp.zeros((HIDDEN,), jnp.float32),
            "o_ln_g": jnp.ones((HIDDEN,), jnp.float32),
            "o_ln_b": jnp.zeros((HIDDEN,), jnp.float32),
        })
    p["pool_w"] = nrm((HIDDEN, HIDDEN), jnp.bfloat16)
    p["pool_b"] = jnp.zeros((HIDDEN,), jnp.float32)
    p["cls_w"] = nrm((HIDDEN, NUM_LABELS), jnp.bfloat16)
    p["cls_b"] = jnp.zeros((NUM_LABELS,), jnp.float32)
    return p


# ----------------- forward pass (mirrors BertForSequenceClassification) -----------------
def bert_forward(params, batch_seqs, batch_seq_masks, batch_seq_segments, labels):
    B, S = batch_seqs.shape

    # Embeddings: word + position + token_type. LayerNorm is fused into layer 0's kernel.
    # TODO(synk): embedding lookup is a tiny gather; kept as JAX glue (jnp.take).
    emb = (jnp.take(params["word_emb"], batch_seqs, axis=0)
           + params["pos_emb"][:S][None, :, :]
           + jnp.take(params["type_emb"], batch_seq_segments, axis=0))   # (B, S, H) f32
    # TODO(synk): dropout (hidden/attention dropout = 0.1) is identity in eval mode; omitted.

    maskf = batch_seq_masks.astype(jnp.float32).reshape(B, 1, S)         # raw 0/1 key mask

    x = emb
    for li, lp in enumerate(params["layers"]):
        x = encoder_layer(x, maskf, params["emb_ln_g"], params["emb_ln_b"], lp,
                          apply_input_ln=(li == 0))

    onehot = jax.nn.one_hot(labels, NUM_LABELS, dtype=jnp.float32)
    logits, probabilities, loss = cls_head(x, params["pool_w"], params["pool_b"],
                                           params["cls_w"], params["cls_b"], onehot)
    return loss[0, 0], logits, probabilities


if __name__ == "__main__":
    key = jax.random.PRNGKey(0)
    pkey, ikey, lkey = jax.random.split(key, 3)
    params = init_params(pkey)

    B, S = 2, 8
    batch_seqs = jax.random.randint(ikey, (B, S), 0, VOCAB, dtype=jnp.int32)
    batch_seq_masks = jnp.ones((B, S), jnp.int32).at[1, 6:].set(0)
    batch_seq_segments = jnp.zeros((B, S), jnp.int32).at[:, 4:].set(1)
    labels = jax.random.randint(lkey, (B,), 0, NUM_LABELS, dtype=jnp.int32)

    fwd = jax.jit(bert_forward)
    loss, logits, probs = fwd(params, batch_seqs, batch_seq_masks, batch_seq_segments, labels)
    jax.block_until_ready((loss, logits, probs))

    assert logits.shape == (B, NUM_LABELS)
    assert probs.shape == (B, NUM_LABELS)
    assert bool(jnp.isfinite(loss))
    assert bool(jnp.allclose(jnp.sum(probs, axis=-1), 1.0, atol=1e-5))
    print("KERNEL_OK")
</pallas_src>

<mosaic_0001>
module attributes {stable_mosaic.version = 11 : i64} {
  func.func @_cls_head_kernel(%arg0: i32, %arg1: memref<2x8x32xbf16, #tpu.memory_space<vmem>>, %arg2: memref<32x32xbf16, #tpu.memory_space<vmem>>, %arg3: memref<1x32xf32, #tpu.memory_space<vmem>>, %arg4: memref<32x3xbf16, #tpu.memory_space<vmem>>, %arg5: memref<1x3xf32, #tpu.memory_space<vmem>>, %arg6: memref<2x3xf32, #tpu.memory_space<vmem>>, %arg7: memref<2x3xf32, #tpu.memory_space<vmem>>, %arg8: memref<2x3xf32, #tpu.memory_space<vmem>>, %arg9: memref<1x1xf32, #tpu.memory_space<vmem>>) attributes {dimension_semantics = [#tpu.dimension_semantics<arbitrary>], iteration_bounds = array<i64: 1>, scalar_prefetch = 0 : i64, scratch_operands = 0 : i64, tpu.core_type = #tpu.core_type<tc>, window_params = [{pipeline_mode = #tpu.pipeline_mode<synchronous>, transform_indices = @transform_0, window_bounds = array<i64: 2, 8, 32>}, {pipeline_mode = #tpu.pipeline_mode<synchronous>, transform_indices = @transform_1, window_bounds = array<i64: 32, 32>}, {pipeline_mode = #tpu.pipeline_mode<synchronous>, transform_indices = @transform_2, window_bounds = array<i64: 1, 32>}, {pipeline_mode = #tpu.pipeline_mode<synchronous>, transform_indices = @transform_3, window_bounds = array<i64: 32, 3>}, {pipeline_mode = #tpu.pipeline_mode<synchronous>, transform_indices = @transform_4, window_bounds = array<i64: 1, 3>}, {pipeline_mode = #tpu.pipeline_mode<synchronous>, transform_indices = @transform_5, window_bounds = array<i64: 2, 3>}, {pipeline_mode = #tpu.pipeline_mode<synchronous>, transform_indices = @transform_6, window_bounds = array<i64: 2, 3>}, {pipeline_mode = #tpu.pipeline_mode<synchronous>, transform_indices = @transform_7, window_bounds = array<i64: 2, 3>}, {pipeline_mode = #tpu.pipeline_mode<synchronous>, transform_indices = @transform_8, window_bounds = array<i64: 1, 1>}]} {
    %c0 = arith.constant 0 : index
    %c0_0 = arith.constant 0 : index
    %c0_1 = arith.constant 0 : index
    %0 = vector.load %arg1[%c0, %c0_0, %c0_1] : memref<2x8x32xbf16, #tpu.memory_space<vmem>>, vector<2x8x32xbf16>
    %1 = arith.extf %0 : vector<2x8x32xbf16> to vector<2x8x32xf32>
    %2 = vector.extract_strided_slice %1 {offsets = [0, 0, 0], sizes = [2, 1, 32], strides = [1, 1, 1]} : vector<2x8x32xf32> to vector<2x1x32xf32>
    %3 = vector.shape_cast %2 : vector<2x1x32xf32> to vector<2x32xf32>
    %4 = arith.truncf %3 : vector<2x32xf32> to vector<2x32xbf16>
    %c0_2 = arith.constant 0 : index
    %c0_3 = arith.constant 0 : index
    %5 = vector.load %arg2[%c0_2, %c0_3] : memref<32x32xbf16, #tpu.memory_space<vmem>>, vector<32x32xbf16>
    %cst = arith.constant dense<0.000000e+00> : vector<2x32xf32>
    %6 = tpu.matmul %4, %5, %cst {dimension_numbers = #tpu.dot_dimension_numbers<[1], [0], [0], [1], [0, 0, 1, 1], [], []>} : vector<2x32xbf16>, vector<32x32xbf16>, vector<2x32xf32> -> vector<2x32xf32>
    %c0_4 = arith.constant 0 : index
    %c0_5 = arith.constant 0 : index
    %7 = vector.load %arg3[%c0_4, %c0_5] : memref<1x32xf32, #tpu.memory_space<vmem>>, vector<1x32xf32>
    %8 = vector.broadcast %7 : vector<1x32xf32> to vector<2x32xf32>
    %9 = arith.addf %6, %8 : vector<2x32xf32>
    %10 = math.tanh %9 : vector<2x32xf32>
    %11 = arith.truncf %10 : vector<2x32xf32> to vector<2x32xbf16>
    %c0_6 = arith.constant 0 : index
    %c0_7 = arith.constant 0 : index
    %12 = vector.load %arg4[%c0_6, %c0_7] : memref<32x3xbf16, #tpu.memory_space<vmem>>, vector<32x3xbf16>
    %cst_8 = arith.constant dense<0.000000e+00> : vector<2x3xf32>
    %13 = tpu.matmul %11, %12, %cst_8 {dimension_numbers = #tpu.dot_dimension_numbers<[1], [0], [0], [1], [0, 0, 1, 1], [], []>} : vector<2x32xbf16>, vector<32x3xbf16>, vector<2x3xf32> -> vector<2x3xf32>
    %c0_9 = arith.constant 0 : index
    %c0_10 = arith.constant 0 : index
    %14 = vector.load %arg5[%c0_9, %c0_10] : memref<1x3xf32, #tpu.memory_space<vmem>>, vector<1x3xf32>
    %15 = vector.broadcast %14 : vector<1x3xf32> to vector<2x3xf32>
    %16 = arith.addf %13, %15 : vector<2x3xf32>
    %c0_11 = arith.constant 0 : index
    %c0_12 = arith.constant 0 : index
    %17 = vector.load %arg7[%c0_11, %c0_12] : memref<2x3xf32, #tpu.memory_space<vmem>>, vector<2x3xf32>
    tpu.vector_store %arg7[%c0_11, %c0_12], %16 {strides = array<i32>} : memref<2x3xf32, #tpu.memory_space<vmem>>, vector<2x3xf32>,
    %cst_13 = arith.constant dense<0xFF800000> : vector<2xf32>
    %18 = vector.multi_reduction <maximumf>, %16, %cst_13 [1] : vector<2x3xf32> to vector<2xf32>
    %19 = vector.shape_cast %18 : vector<2xf32> to vector<2x1xf32>
    %20 = vector.broadcast %19 : vector<2x1xf32> to vector<2x3xf32>
    %21 = arith.subf %16, %20 : vector<2x3xf32>
    %22 = math.exp %21 : vector<2x3xf32>
    %cst_14 = arith.constant dense<0.000000e+00> : vector<2xf32>
    %23 = vector.multi_reduction <add>, %22, %cst_14 [1] : vector<2x3xf32> to vector<2xf32>
    %24 = vector.shape_cast %23 : vector<2xf32> to vector<2x1xf32>
    %25 = vector.broadcast %24 : vector<2x1xf32> to vector<2x3xf32>
    %26 = arith.divf %22, %25 : vector<2x3xf32>
    %c0_15 = arith.constant 0 : index
    %c0_16 = arith.constant 0 : index
    %27 = vector.load %arg8[%c0_15, %c0_16] : memref<2x3xf32, #tpu.memory_space<vmem>>, vector<2x3xf32>
    tpu.vector_store %arg8[%c0_15, %c0_16], %26 {strides = array<i32>} : memref<2x3xf32, #tpu.memory_space<vmem>>, vector<2x3xf32>,
    %28 = vector.broadcast %19 : vector<2x1xf32> to vector<2x3xf32>
    %29 = arith.subf %16, %28 : vector<2x3xf32>
    %30 = math.log %24 : vector<2x1xf32>
    %31 = vector.broadcast %30 : vector<2x1xf32> to vector<2x3xf32>
    %32 = arith.subf %29, %31 : vector<2x3xf32>
    %c0_17 = arith.constant 0 : index
    %c0_18 = arith.constant 0 : index
    %33 = vector.load %arg6[%c0_17, %c0_18] : memref<2x3xf32, #tpu.memory_space<vmem>>, vector<2x3xf32>
    %34 = arith.mulf %33, %32 : vector<2x3xf32>
    %cst_19 = arith.constant dense<0.000000e+00> : vector<2xf32>
    %35 = vector.multi_reduction <add>, %34, %cst_19 [1] : vector<2x3xf32> to vector<2xf32>
    %36 = vector.shape_cast %35 : vector<2xf32> to vector<2x1xf32>
    %cst_20 = arith.constant 0.000000e+00 : f32
    %37 = vector.broadcast %cst_20 : f32 to vector<2x1xf32>
    %38 = arith.subf %37, %36 : vector<2x1xf32>
    %39 = vector.shape_cast %38 : vector<2x1xf32> to vector<1x2x1xf32>
    %cst_21 = arith.constant dense<0.000000e+00> : vector<1xf32>
    %40 = vector.multi_reduction <add>, %39, %cst_21 [1, 2] : vector<1x2x1xf32> to vector<1xf32>
    %41 = vector.shape_cast %40 : vector<1xf32> to vector<1x1x1xf32>
    %42 = vector.extract %41[0, 0, 0] : f32 from vector<1x1x1xf32>
    %43 = vector.broadcast %42 : f32 to vector<1x1xf32>
    %cst_22 = arith.constant 2.000000e+00 : f32
    %44 = vector.broadcast %cst_22 : f32 to vector<1x1xf32>
    %45 = arith.divf %43, %44 : vector<1x1xf32>
    %c0_23 = arith.constant 0 : index
    %c0_24 = arith.constant 0 : index
    %46 = vector.load %arg9[%c0_23, %c0_24] : memref<1x1xf32, #tpu.memory_space<vmem>>, vector<1x1xf32>
    tpu.vector_store %arg9[%c0_23, %c0_24], %45 {strides = array<i32>} : memref<1x1xf32, #tpu.memory_space<vmem>>, vector<1x1xf32>,
    return
  }
  func.func @transform_0(%arg0: i32) -> (i32, i32, i32) {
    %c0_i32 = arith.constant 0 : i32
    %c0_i32_0 = arith.constant 0 : i32
    %c0_i32_1 = arith.constant 0 : i32
    %c0_i32_2 = arith.constant 0 : i32
    return %c0_i32, %c0_i32_0, %c0_i32_1 : i32, i32, i32
  }
  func.func @transform_1(%arg0: i32) -> (i32, i32) {
    %c0_i32 = arith.constant 0 : i32
    %c0_i32_0 = arith.constant 0 : i32
    %c0_i32_1 = arith.constant 0 : i32
    return %c0_i32, %c0_i32_0 : i32, i32
  }
  func.func @transform_2(%arg0: i32) -> (i32, i32) {
    %c0_i32 = arith.constant 0 : i32
    %c0_i32_0 = arith.constant 0 : i32
    %c0_i32_1 = arith.constant 0 : i32
    return %c0_i32, %c0_i32_0 : i32, i32
  }
  func.func @transform_3(%arg0: i32) -> (i32, i32) {
    %c0_i32 = arith.constant 0 : i32
    %c0_i32_0 = arith.constant 0 : i32
    %c0_i32_1 = arith.constant 0 : i32
    return %c0_i32, %c0_i32_0 : i32, i32
  }
  func.func @transform_4(%arg0: i32) -> (i32, i32) {
    %c0_i32 = arith.constant 0 : i32
    %c0_i32_0 = arith.constant 0 : i32
    %c0_i32_1 = arith.constant 0 : i32
    return %c0_i32, %c0_i32_0 : i32, i32
  }
  func.func @transform_5(%arg0: i32) -> (i32, i32) {
    %c0_i32 = arith.constant 0 : i32
    %c0_i32_0 = arith.constant 0 : i32
    %c0_i32_1 = arith.constant 0 : i32
    return %c0_i32, %c0_i32_0 : i32, i32
  }
  func.func @transform_6(%arg0: i32) -> (i32, i32) {
    %c0_i32 = arith.constant 0 : i32
    %c0_i32_0 = arith.constant 0 : i32
    %c0_i32_1 = arith.constant 0 : i32
    return %c0_i32, %c0_i32_0 : i32, i32
  }
  func.func @transform_7(%arg0: i32) -> (i32, i32) {
    %c0_i32 = arith.constant 0 : i32
    %c0_i32_0 = arith.constant 0 : i32
    %c0_i32_1 = arith.constant 0 : i32
    return %c0_i32, %c0_i32_0 : i32, i32
  }
  func.func @transform_8(%arg0: i32) -> (i32, i32) {
    %c0_i32 = arith.constant 0 : i32
    %c0_i32_0 = arith.constant 0 : i32
    %c0_i32_1 = arith.constant 0 : i32
    return %c0_i32, %c0_i32_0 : i32, i32
  }
}

module attributes {stable_mosaic.version = 11 : i64} {
  func.func @_encoder_layer_kernel(%arg0: i32, %arg1: memref<1x8x32xbf16, #tpu.memory_space<vmem>>, %arg2: memref<1x1x8xf32, #tpu.memory_space<vmem>>, %arg3: memref<1x32xf32, #tpu.memory_space<vmem>>, %arg4: memref<1x32xf32, #tpu.memory_space<vmem>>, %arg5: memref<32x96xbf16, #tpu.memory_space<vmem>>, %arg6: memref<1x96xf32, #tpu.memory_space<vmem>>, %arg7: memref<32x32xbf16, #tpu.memory_space<vmem>>, %arg8: memref<1x32xf32, #tpu.memory_space<vmem>>, %arg9: memref<1x32xf32, #tpu.memory_space<vmem>>, %arg10: memref<1x32xf32, #tpu.memory_space<vmem>>, %arg11: memref<32x64xbf16, #tpu.memory_space<vmem>>, %arg12: memref<1x64xf32, #tpu.memory_space<vmem>>, %arg13: memref<64x32xbf16, #tpu.memory_space<vmem>>, %arg14: memref<1x32xf32, #tpu.memory_space<vmem>>, %arg15: memref<1x32xf32, #tpu.memory_space<vmem>>, %arg16: memref<1x32xf32, #tpu.memory_space<vmem>>, %arg17: memref<1x8x32xbf16, #tpu.memory_space<vmem>>) attributes {dimension_semantics = [#tpu.dimension_semantics<parallel>], iteration_bounds = array<i64: 2>, scalar_prefetch = 0 : i64, scratch_operands = 0 : i64, tpu.core_type = #tpu.core_type<tc>, window_params = [{transform_indices = @transform_0, window_bounds = array<i64: 1, 8, 32>}, {transform_indices = @transform_1, window_bounds = array<i64: 1, 1, 8>}, {pipeline_mode = #tpu.pipeline_mode<synchronous>, transform_indices = @transform_2, window_bounds = array<i64: 1, 32>}, {pipeline_mode = #tpu.pipeline_mode<synchronous>, transform_indices = @transform_3, window_bounds = array<i64: 1, 32>}, {pipeline_mode = #tpu.pipeline_mode<synchronous>, transform_indices = @transform_4, window_bounds = array<i64: 32, 96>}, {pipeline_mode = #tpu.pipeline_mode<synchronous>, transform_indices = @transform_5, window_bounds = array<i64: 1, 96>}, {pipeline_mode = #tpu.pipeline_mode<synchronous>, transform_indices = @transform_6, window_bounds = array<i64: 32, 32>}, {pipeline_mode = #tpu.pipeline_mode<synchronous>, transform_indices = @transform_7, window_bounds = array<i64: 1, 32>}, {pipeline_mode = #tpu.pipeline_mode<synchronous>, transform_indices = @transform_8, window_bounds = array<i64: 1, 32>}, {pipeline_mode = #tpu.pipeline_mode<synchronous>, transform_indices = @transform_9, window_bounds = array<i64: 1, 32>}, {pipeline_mode = #tpu.pipeline_mode<synchronous>, transform_indices = @transform_10, window_bounds = array<i64: 32, 64>}, {pipeline_mode = #tpu.pipeline_mode<synchronous>, transform_indices = @transform_11, window_bounds = array<i64: 1, 64>}, {pipeline_mode = #tpu.pipeline_mode<synchronous>, transform_indices = @transform_12, window_bounds = array<i64: 64, 32>}, {pipeline_mode = #tpu.pipeline_mode<synchronous>, transform_indices = @transform_13, window_bounds = array<i64: 1, 32>}, {pipeline_mode = #tpu.pipeline_mode<synchronous>, transform_indices = @transform_14, window_bounds = array<i64: 1, 32>}, {pipeline_mode = #tpu.pipeline_mode<synchronous>, transform_indices = @transform_15, window_bounds = array<i64: 1, 32>}, {transform_indices = @transform_16, window_bounds = array<i64: 1, 8, 32>}]} {
    %c0 = arith.constant 0 : index
    %c0_0 = arith.constant 0 : index
    %c0_1 = arith.constant 0 : index
    %0 = vector.load %arg1[%c0, %c0_0, %c0_1] : memref<1x8x32xbf16, #tpu.memory_space<vmem>>, vector<1x8x32xbf16>
    %1 = vector.shape_cast %0 : vector<1x8x32xbf16> to vector<8x32xbf16>
    %2 = arith.extf %1 : vector<8x32xbf16> to vector<8x32xf32>
    %c0_2 = arith.constant 0 : index
    %c0_3 = arith.constant 0 : index
    %c0_4 = arith.constant 0 : index
    %3 = vector.load %arg2[%c0_2, %c0_3, %c0_4] : memref<1x1x8xf32, #tpu.memory_space<vmem>>, vector<1x1x8xf32>
    %4 = vector.shape_cast %3 : vector<1x1x8xf32> to vector<1x8xf32>
    %cst = arith.constant 1.000000e+00 : f32
    %5 = vector.broadcast %cst : f32 to vector<1x8xf32>
    %6 = arith.subf %5, %4 : vector<1x8xf32>
    %cst_5 = arith.constant -1.000000e+09 : f32
    %7 = vector.broadcast %cst_5 : f32 to vector<1x8xf32>
    %8 = arith.mulf %6, %7 : vector<1x8xf32>
    %9 = arith.truncf %2 : vector<8x32xf32> to vector<8x32xbf16>
    %c0_6 = arith.constant 0 : index
    %c0_7 = arith.constant 0 : index
    %10 = vector.load %arg5[%c0_6, %c0_7] : memref<32x96xbf16, #tpu.memory_space<vmem>>, vector<32x96xbf16>
    %cst_8 = arith.constant dense<0.000000e+00> : vector<8x96xf32>
    %11 = tpu.matmul %9, %10, %cst_8 {dimension_numbers = #tpu.dot_dimension_numbers<[1], [0], [0], [1], [0, 0, 1, 1], [], []>} : vector<8x32xbf16>, vector<32x96xbf16>, vector<8x96xf32> -> vector<8x96xf32>
    %c0_9 = arith.constant 0 : index
    %c0_10 = arith.constant 0 : index
    %12 = vector.load %arg6[%c0_9, %c0_10] : memref<1x96xf32, #tpu.memory_space<vmem>>, vector<1x96xf32>
    %13 = vector.broadcast %12 : vector<1x96xf32> to vector<8x96xf32>
    %14 = arith.addf %11, %13 : vector<8x96xf32>
    %15 = arith.truncf %14 : vector<8x96xf32> to vector<8x96xbf16>
    %16 = vector.extract_strided_slice %15 {offsets = [0, 0], sizes = [8, 8], strides = [1, 1]} : vector<8x96xbf16> to vector<8x8xbf16>
    %17 = vector.extract_strided_slice %15 {offsets = [0, 32], sizes = [8, 8], strides = [1, 1]} : vector<8x96xbf16> to vector<8x8xbf16>
    %18 = vector.extract_strided_slice %15 {offsets = [0, 64], sizes = [8, 8], strides = [1, 1]} : vector<8x96xbf16> to vector<8x8xbf16>
    %cst_11 = arith.constant dense<0.000000e+00> : vector<8x8xf32>
    %19 = tpu.matmul %16, %17, %cst_11 {dimension_numbers = #tpu.dot_dimension_numbers<[1], [1], [0], [0], [0, 0, 1, 0], [], []>} : vector<8x8xbf16>, vector<8x8xbf16>, vector<8x8xf32> -> vector<8x8xf32>
    %cst_12 = arith.constant 0.353553385 : f32
    %20 = vector.broadcast %cst_12 : f32 to vector<8x8xf32>
    %21 = arith.mulf %19, %20 : vector<8x8xf32>
    %22 = vector.broadcast %8 : vector<1x8xf32> to vector<8x8xf32>
    %23 = arith.addf %21, %22 : vector<8x8xf32>
    %cst_13 = arith.constant dense<0xFF800000> : vector<8xf32>
    %24 = vector.multi_reduction <maximumf>, %23, %cst_13 [1] : vector<8x8xf32> to vector<8xf32>
    %25 = vector.shape_cast %24 : vector<8xf32> to vector<8x1xf32>
    %26 = vector.broadcast %25 : vector<8x1xf32> to vector<8x8xf32>
    %27 = arith.subf %23, %26 : vector<8x8xf32>
    %28 = math.exp %27 : vector<8x8xf32>
    %cst_14 = arith.constant dense<0.000000e+00> : vector<8xf32>
    %29 = vector.multi_reduction <add>, %28, %cst_14 [1] : vector<8x8xf32> to vector<8xf32>
    %30 = vector.shape_cast %29 : vector<8xf32> to vector<8x1xf32>
    %31 = tpu.reciprocal %30 {approx = true} : vector<8x1xf32> -> vector<8x1xf32>
    %32 = vector.broadcast %31 : vector<8x1xf32> to vector<8x8xf32>
    %33 = arith.mulf %28, %32 : vector<8x8xf32>
    %34 = arith.truncf %33 : vector<8x8xf32> to vector<8x8xbf16>
    %cst_15 = arith.constant dense<0.000000e+00> : vector<8x8xf32>
    %35 = tpu.matmul %34, %18, %cst_15 {dimension_numbers = #tpu.dot_dimension_numbers<[1], [0], [0], [1], [0, 0, 1, 1], [], []>} : vector<8x8xbf16>, vector<8x8xbf16>, vector<8x8xf32> -> vector<8x8xf32>
    %36 = vector.extract_strided_slice %15 {offsets = [0, 8], sizes = [8, 8], strides = [1, 1]} : vector<8x96xbf16> to vector<8x8xbf16>
    %37 = vector.extract_strided_slice %15 {offsets = [0, 40], sizes = [8, 8], strides = [1, 1]} : vector<8x96xbf16> to vector<8x8xbf16>
    %38 = vector.extract_strided_slice %15 {offsets = [0, 72], sizes = [8, 8], strides = [1, 1]} : vector<8x96xbf16> to vector<8x8xbf16>
    %cst_16 = arith.constant dense<0.000000e+00> : vector<8x8xf32>
    %39 = tpu.matmul %36, %37, %cst_16 {dimension_numbers = #tpu.dot_dimension_numbers<[1], [1], [0], [0], [0, 0, 1, 0], [], []>} : vector<8x8xbf16>, vector<8x8xbf16>, vector<8x8xf32> -> vector<8x8xf32>
    %cst_17 = arith.constant 0.353553385 : f32
    %40 = vector.broadcast %cst_17 : f32 to vector<8x8xf32>
    %41 = arith.mulf %39, %40 : vector<8x8xf32>
    %42 = vector.broadcast %8 : vector<1x8xf32> to vector<8x8xf32>
    %43 = arith.addf %41, %42 : vector<8x8xf32>
    %cst_18 = arith.constant dense<0xFF800000> : vector<8xf32>
    %44 = vector.multi_reduction <maximumf>, %43, %cst_18 [1] : vector<8x8xf32> to vector<8xf32>
    %45 = vector.shape_cast %44 : vector<8xf32> to vector<8x1xf32>
    %46 = vector.broadcast %45 : vector<8x1xf32> to vector<8x8xf32>
    %47 = arith.subf %43, %46 : vector<8x8xf32>
    %48 = math.exp %47 : vector<8x8xf32>
    %cst_19 = arith.constant dense<0.000000e+00> : vector<8xf32>
    %49 = vector.multi_reduction <add>, %48, %cst_19 [1] : vector<8x8xf32> to vector<8xf32>
    %50 = vector.shape_cast %49 : vector<8xf32> to vector<8x1xf32>
    %51 = tpu.reciprocal %50 {approx = true} : vector<8x1xf32> -> vector<8x1xf32>
    %52 = vector.broadcast %51 : vector<8x1xf32> to vector<8x8xf32>
    %53 = arith.mulf %48, %52 : vector<8x8xf32>
    %54 = arith.truncf %53 : vector<8x8xf32> to vector<8x8xbf16>
    %cst_20 = arith.constant dense<0.000000e+00> : vector<8x8xf32>
    %55 = tpu.matmul %54, %38, %cst_20 {dimension_numbers = #tpu.dot_dimension_numbers<[1], [0], [0], [1], [0, 0, 1, 1], [], []>} : vector<8x8xbf16>, vector<8x8xbf16>, vector<8x8xf32> -> vector<8x8xf32>
    %56 = vector.extract_strided_slice %15 {offsets = [0, 16], sizes = [8, 8], strides = [1, 1]} : vector<8x96xbf16> to vector<8x8xbf16>
    %57 = vector.extract_strided_slice %15 {offsets = [0, 48], sizes = [8, 8], strides = [1, 1]} : vector<8x96xbf16> to vector<8x8xbf16>
    %58 = vector.extract_strided_slice %15 {offsets = [0, 80], sizes = [8, 8], strides = [1, 1]} : vector<8x96xbf16> to vector<8x8xbf16>
    %cst_21 = arith.constant dense<0.000000e+00> : vector<8x8xf32>
    %59 = tpu.matmul %56, %57, %cst_21 {dimension_numbers = #tpu.dot_dimension_numbers<[1], [1], [0], [0], [0, 0, 1, 0], [], []>} : vector<8x8xbf16>, vector<8x8xbf16>, vector<8x8xf32> -> vector<8x8xf32>
    %cst_22 = arith.constant 0.353553385 : f32
    %60 = vector.broadcast %cst_22 : f32 to vector<8x8xf32>
    %61 = arith.mulf %59, %60 : vector<8x8xf32>
    %62 = vector.broadcast %8 : vector<1x8xf32> to vector<8x8xf32>
    %63 = arith.addf %61, %62 : vector<8x8xf32>
    %cst_23 = arith.constant dense<0xFF800000> : vector<8xf32>
    %64 = vector.multi_reduction <maximumf>, %63, %cst_23 [1] : vector<8x8xf32> to vector<8xf32>
    %65 = vector.shape_cast %64 : vector<8xf32> to vector<8x1xf32>
    %66 = vector.broadcast %65 : vector<8x1xf32> to vector<8x8xf32>
    %67 = arith.subf %63, %66 : vector<8x8xf32>
    %68 = math.exp %67 : vector<8x8xf32>
    %cst_24 = arith.constant dense<0.000000e+00> : vector<8xf32>
    %69 = vector.multi_reduction <add>, %68, %cst_24 [1] : vector<8x8xf32> to vector<8xf32>
    %70 = vector.shape_cast %69 : vector<8xf32> to vector<8x1xf32>
    %71 = tpu.reciprocal %70 {approx = true} : vector<8x1xf32> -> vector<8x1xf32>
    %72 = vector.broadcast %71 : vector<8x1xf32> to vector<8x8xf32>
    %73 = arith.mulf %68, %72 : vector<8x8xf32>
    %74 = arith.truncf %73 : vector<8x8xf32> to vector<8x8xbf16>
    %cst_25 = arith.constant dense<0.000000e+00> : vector<8x8xf32>
    %75 = tpu.matmul %74, %58, %cst_25 {dimension_numbers = #tpu.dot_dimension_numbers<[1], [0], [0], [1], [0, 0, 1, 1], [], []>} : vector<8x8xbf16>, vector<8x8xbf16>, vector<8x8xf32> -> vector<8x8xf32>
    %76 = vector.extract_strided_slice %15 {offsets = [0, 24], sizes = [8, 8], strides = [1, 1]} : vector<8x96xbf16> to vector<8x8xbf16>
    %77 = vector.extract_strided_slice %15 {offsets = [0, 56], sizes = [8, 8], strides = [1, 1]} : vector<8x96xbf16> to vector<8x8xbf16>
    %78 = vector.extract_strided_slice %15 {offsets = [0, 88], sizes = [8, 8], strides = [1, 1]} : vector<8x96xbf16> to vector<8x8xbf16>
    %cst_26 = arith.constant dense<0.000000e+00> : vector<8x8xf32>
    %79 = tpu.matmul %76, %77, %cst_26 {dimension_numbers = #tpu.dot_dimension_numbers<[1], [1], [0], [0], [0, 0, 1, 0], [], []>} : vector<8x8xbf16>, vector<8x8xbf16>, vector<8x8xf32> -> vector<8x8xf32>
    %cst_27 = arith.constant 0.353553385 : f32
    %80 = vector.broadcast %cst_27 : f32 to vector<8x8xf32>
    %81 = arith.mulf %79, %80 : vector<8x8xf32>
    %82 = vector.broadcast %8 : vector<1x8xf32> to vector<8x8xf32>
    %83 = arith.addf %81, %82 : vector<8x8xf32>
    %cst_28 = arith.constant dense<0xFF800000> : vector<8xf32>
    %84 = vector.multi_reduction <maximumf>, %83, %cst_28 [1] : vector<8x8xf32> to vector<8xf32>
    %85 = vector.shape_cast %84 : vector<8xf32> to vector<8x1xf32>
    %86 = vector.broadcast %85 : vector<8x1xf32> to vector<8x8xf32>
    %87 = arith.subf %83, %86 : vector<8x8xf32>
    %88 = math.exp %87 : vector<8x8xf32>
    %cst_29 = arith.constant dense<0.000000e+00> : vector<8xf32>
    %89 = vector.multi_reduction <add>, %88, %cst_29 [1] : vector<8x8xf32> to vector<8xf32>
    %90 = vector.shape_cast %89 : vector<8xf32> to vector<8x1xf32>
    %91 = tpu.reciprocal %90 {approx = true} : vector<8x1xf32> -> vector<8x1xf32>
    %92 = vector.broadcast %91 : vector<8x1xf32> to vector<8x8xf32>
    %93 = arith.mulf %88, %92 : vector<8x8xf32>
    %94 = arith.truncf %93 : vector<8x8xf32> to vector<8x8xbf16>
    %cst_30 = arith.constant dense<0.000000e+00> : vector<8x8xf32>
    %95 = tpu.matmul %94, %78, %cst_30 {dimension_numbers = #tpu.dot_dimension_numbers<[1], [0], [0], [1], [0, 0, 1, 1], [], []>} : vector<8x8xbf16>, vector<8x8xbf16>, vector<8x8xf32> -> vector<8x8xf32>
    %96 = tpu.concatenate %35, %55, %75, %95 in 1 : vector<8x8xf32>, vector<8x8xf32>, vector<8x8xf32>, vector<8x8xf32> -> vector<8x32xf32>
    %97 = arith.truncf %96 : vector<8x32xf32> to vector<8x32xbf16>
    %c0_31 = arith.constant 0 : index
    %c0_32 = arith.constant 0 : index
    %98 = vector.load %arg7[%c0_31, %c0_32] : memref<32x32xbf16, #tpu.memory_space<vmem>>, vector<32x32xbf16>
    %cst_33 = arith.constant dense<0.000000e+00> : vector<8x32xf32>
    %99 = tpu.matmul %97, %98, %cst_33 {dimension_numbers = #tpu.dot_dimension_numbers<[1], [0], [0], [1], [0, 0, 1, 1], [], []>} : vector<8x32xbf16>, vector<32x32xbf16>, vector<8x32xf32> -> vector<8x32xf32>
    %c0_34 = arith.constant 0 : index
    %c0_35 = arith.constant 0 : index
    %100 = vector.load %arg8[%c0_34, %c0_35] : memref<1x32xf32, #tpu.memory_space<vmem>>, vector<1x32xf32>
    %101 = vector.broadcast %100 : vector<1x32xf32> to vector<8x32xf32>
    %102 = arith.addf %99, %101 : vector<8x32xf32>
    %103 = arith.addf %102, %2 : vector<8x32xf32>
    %c0_36 = arith.constant 0 : index
    %c0_37 = arith.constant 0 : index
    %104 = vector.load %arg9[%c0_36, %c0_37] : memref<1x32xf32, #tpu.memory_space<vmem>>, vector<1x32xf32>
    %c0_38 = arith.constant 0 : index
    %c0_39 = arith.constant 0 : index
    %105 = vector.load %arg10[%c0_38, %c0_39] : memref<1x32xf32, #tpu.memory_space<vmem>>, vector<1x32xf32>
    %cst_40 = arith.constant dense<0.000000e+00> : vector<8xf32>
    %106 = vector.multi_reduction <add>, %103, %cst_40 [1] : vector<8x32xf32> to vector<8xf32>
    %107 = vector.shape_cast %106 : vector<8xf32> to vector<8x1xf32>
    %cst_41 = arith.constant 3.200000e+01 : f32
    %108 = vector.broadcast %cst_41 : f32 to vector<8x1xf32>
    %109 = arith.divf %107, %108 : vector<8x1xf32>
    %110 = vector.broadcast %109 : vector<8x1xf32> to vector<8x32xf32>
    %111 = arith.subf %103, %110 : vector<8x32xf32>
    %112 = arith.mulf %111, %111 : vector<8x32xf32>
    %cst_42 = arith.constant dense<0.000000e+00> : vector<8xf32>
    %113 = vector.multi_reduction <add>, %112, %cst_42 [1] : vector<8x32xf32> to vector<8xf32>
    %114 = vector.shape_cast %113 : vector<8xf32> to vector<8x1xf32>
    %cst_43 = arith.constant 3.200000e+01 : f32
    %115 = vector.broadcast %cst_43 : f32 to vector<8x1xf32>
    %116 = arith.divf %114, %115 : vector<8x1xf32>
    %117 = vector.broadcast %109 : vector<8x1xf32> to vector<8x32xf32>
    %118 = arith.subf %103, %117 : vector<8x32xf32>
    %cst_44 = arith.constant 9.99999996E-13 : f32
    %119 = vector.broadcast %cst_44 : f32 to vector<8x1xf32>
    %120 = arith.addf %116, %119 : vector<8x1xf32>
    %121 = math.rsqrt %120 : vector<8x1xf32>
    %122 = vector.broadcast %121 : vector<8x1xf32> to vector<8x32xf32>
    %123 = arith.mulf %118, %122 : vector<8x32xf32>
    %124 = vector.broadcast %104 : vector<1x32xf32> to vector<8x32xf32>
    %125 = arith.mulf %123, %124 : vector<8x32xf32>
    %126 = vector.broadcast %105 : vector<1x32xf32> to vector<8x32xf32>
    %127 = arith.addf %125, %126 : vector<8x32xf32>
    %128 = arith.truncf %127 : vector<8x32xf32> to vector<8x32xbf16>
    %c0_45 = arith.constant 0 : index
    %c0_46 = arith.constant 0 : index
    %129 = vector.load %arg11[%c0_45, %c0_46] : memref<32x64xbf16, #tpu.memory_space<vmem>>, vector<32x64xbf16>
    %cst_47 = arith.constant dense<0.000000e+00> : vector<8x64xf32>
    %130 = tpu.matmul %128, %129, %cst_47 {dimension_numbers = #tpu.dot_dimension_numbers<[1], [0], [0], [1], [0, 0, 1, 1], [], []>} : vector<8x32xbf16>, vector<32x64xbf16>, vector<8x64xf32> -> vector<8x64xf32>
    %c0_48 = arith.constant 0 : index
    %c0_49 = arith.constant 0 : index
    %131 = vector.load %arg12[%c0_48, %c0_49] : memref<1x64xf32, #tpu.memory_space<vmem>>, vector<1x64xf32>
    %132 = vector.broadcast %131 : vector<1x64xf32> to vector<8x64xf32>
    %133 = arith.addf %130, %132 : vector<8x64xf32>
    %cst_50 = arith.constant 5.000000e-01 : f32
    %134 = vector.broadcast %cst_50 : f32 to vector<8x64xf32>
    %135 = arith.mulf %134, %133 : vector<8x64xf32>
    %cst_51 = arith.constant 0.707106769 : f32
    %136 = vector.broadcast %cst_51 : f32 to vector<8x64xf32>
    %137 = arith.mulf %133, %136 : vector<8x64xf32>
    %138 = math.erf %137 : vector<8x64xf32>
    %cst_52 = arith.constant 1.000000e+00 : f32
    %139 = vector.broadcast %cst_52 : f32 to vector<8x64xf32>
    %140 = arith.addf %139, %138 : vector<8x64xf32>
    %141 = arith.mulf %135, %140 : vector<8x64xf32>
    %142 = arith.truncf %141 : vector<8x64xf32> to vector<8x64xbf16>
    %c0_53 = arith.constant 0 : index
    %c0_54 = arith.constant 0 : index
    %143 = vector.load %arg13[%c0_53, %c0_54] : memref<64x32xbf16, #tpu.memory_space<vmem>>, vector<64x32xbf16>
    %cst_55 = arith.constant dense<0.000000e+00> : vector<8x32xf32>
    %144 = tpu.matmul %142, %143, %cst_55 {dimension_numbers = #tpu.dot_dimension_numbers<[1], [0], [0], [1], [0, 0, 1, 1], [], []>} : vector<8x64xbf16>, vector<64x32xbf16>, vector<8x32xf32> -> vector<8x32xf32>
    %c0_56 = arith.constant 0 : index
    %c0_57 = arith.constant 0 : index
    %145 = vector.load %arg14[%c0_56, %c0_57] : memref<1x32xf32, #tpu.memory_space<vmem>>, vector<1x32xf32>
    %146 = vector.broadcast %145 : vector<1x32xf32> to vector<8x32xf32>
    %147 = arith.addf %144, %146 : vector<8x32xf32>
    %148 = arith.addf %147, %127 : vector<8x32xf32>
    %c0_58 = arith.constant 0 : index
    %c0_59 = arith.constant 0 : index
    %149 = vector.load %arg15[%c0_58, %c0_59] : memref<1x32xf32, #tpu.memory_space<vmem>>, vector<1x32xf32>
    %c0_60 = arith.constant 0 : index
    %c0_61 = arith.constant 0 : index
    %150 = vector.load %arg16[%c0_60, %c0_61] : memref<1x32xf32, #tpu.memory_space<vmem>>, vector<1x32xf32>
    %cst_62 = arith.constant dense<0.000000e+00> : vector<8xf32>
    %151 = vector.multi_reduction <add>, %148, %cst_62 [1] : vector<8x32xf32> to vector<8xf32>
    %152 = vector.shape_cast %151 : vector<8xf32> to vector<8x1xf32>
    %cst_63 = arith.constant 3.200000e+01 : f32
    %153 = vector.broadcast %cst_63 : f32 to vector<8x1xf32>
    %154 = arith.divf %152, %153 : vector<8x1xf32>
    %155 = vector.broadcast %154 : vector<8x1xf32> to vector<8x32xf32>
    %156 = arith.subf %148, %155 : vector<8x32xf32>
    %157 = arith.mulf %156, %156 : vector<8x32xf32>
    %cst_64 = arith.constant dense<0.000000e+00> : vector<8xf32>
    %158 = vector.multi_reduction <add>, %157, %cst_64 [1] : vector<8x32xf32> to vector<8xf32>
    %159 = vector.shape_cast %158 : vector<8xf32> to vector<8x1xf32>
    %cst_65 = arith.constant 3.200000e+01 : f32
    %160 = vector.broadcast %cst_65 : f32 to vector<8x1xf32>
    %161 = arith.divf %159, %160 : vector<8x1xf32>
    %162 = vector.broadcast %154 : vector<8x1xf32> to vector<8x32xf32>
    %163 = arith.subf %148, %162 : vector<8x32xf32>
    %cst_66 = arith.constant 9.99999996E-13 : f32
    %164 = vector.broadcast %cst_66 : f32 to vector<8x1xf32>
    %165 = arith.addf %161, %164 : vector<8x1xf32>
    %166 = math.rsqrt %165 : vector<8x1xf32>
    %167 = vector.broadcast %166 : vector<8x1xf32> to vector<8x32xf32>
    %168 = arith.mulf %163, %167 : vector<8x32xf32>
    %169 = vector.broadcast %149 : vector<1x32xf32> to vector<8x32xf32>
    %170 = arith.mulf %168, %169 : vector<8x32xf32>
    %171 = vector.broadcast %150 : vector<1x32xf32> to vector<8x32xf32>
    %172 = arith.addf %170, %171 : vector<8x32xf32>
    %173 = vector.shape_cast %172 : vector<8x32xf32> to vector<1x8x32xf32>
    %174 = arith.truncf %173 : vector<1x8x32xf32> to vector<1x8x32xbf16>
    %c0_67 = arith.constant 0 : index
    %c0_68 = arith.constant 0 : index
    %c0_69 = arith.constant 0 : index
    %175 = vector.load %arg17[%c0_67, %c0_68, %c0_69] : memref<1x8x32xbf16, #tpu.memory_space<vmem>>, vector<1x8x32xbf16>
    tpu.vector_store %arg17[%c0_67, %c0_68, %c0_69], %174 {strides = array<i32>} : memref<1x8x32xbf16, #tpu.memory_space<vmem>>, vector<1x8x32xbf16>,
    return
  }
  func.func @transform_0(%arg0: i32) -> (i32, i32, i32) {
    %c0_i32 = arith.constant 0 : i32
    %c0_i32_0 = arith.constant 0 : i32
    %c0_i32_1 = arith.constant 0 : i32
    return %arg0, %c0_i32, %c0_i32_0 : i32, i32, i32
  }
  func.func @transform_1(%arg0: i32) -> (i32, i32, i32) {
    %c0_i32 = arith.constant 0 : i32
    %c0_i32_0 = arith.constant 0 : i32
    %c0_i32_1 = arith.constant 0 : i32
    return %arg0, %c0_i32, %c0_i32_0 : i32, i32, i32
  }
  func.func @transform_2(%arg0: i32) -> (i32, i32) {
    %c0_i32 = arith.constant 0 : i32
    %c0_i32_0 = arith.constant 0 : i32
    %c0_i32_1 = arith.constant 0 : i32
    return %c0_i32, %c0_i32_0 : i32, i32
  }
  func.func @transform_3(%arg0: i32) -> (i32, i32) {
    %c0_i32 = arith.constant 0 : i32
    %c0_i32_0 = arith.constant 0 : i32
    %c0_i32_1 = arith.constant 0 : i32
    return %c0_i32, %c0_i32_0 : i32, i32
  }
  func.func @transform_4(%arg0: i32) -> (i32, i32) {
    %c0_i32 = arith.constant 0 : i32
    %c0_i32_0 = arith.constant 0 : i32
    %c0_i32_1 = arith.constant 0 : i32
    return %c0_i32, %c0_i32_0 : i32, i32
  }
  func.func @transform_5(%arg0: i32) -> (i32, i32) {
    %c0_i32 = arith.constant 0 : i32
    %c0_i32_0 = arith.constant 0 : i32
    %c0_i32_1 = arith.constant 0 : i32
    return %c0_i32, %c0_i32_0 : i32, i32
  }
  func.func @transform_6(%arg0: i32) -> (i32, i32) {
    %c0_i32 = arith.constant 0 : i32
    %c0_i32_0 = arith.constant 0 : i32
    %c0_i32_1 = arith.constant 0 : i32
    return %c0_i32, %c0_i32_0 : i32, i32
  }
  func.func @transform_7(%arg0: i32) -> (i32, i32) {
    %c0_i32 = arith.constant 0 : i32
    %c0_i32_0 = arith.constant 0 : i32
    %c0_i32_1 = arith.constant 0 : i32
    return %c0_i32, %c0_i32_0 : i32, i32
  }
  func.func @transform_8(%arg0: i32) -> (i32, i32) {
    %c0_i32 = arith.constant 0 : i32
    %c0_i32_0 = arith.constant 0 : i32
    %c0_i32_1 = arith.constant 0 : i32
    return %c0_i32, %c0_i32_0 : i32, i32
  }
  func.func @transform_9(%arg0: i32) -> (i32, i32) {
    %c0_i32 = arith.constant 0 : i32
    %c0_i32_0 = arith.constant 0 : i32
    %c0_i32_1 = arith.constant 0 : i32
    return %c0_i32, %c0_i32_0 : i32, i32
  }
  func.func @transform_10(%arg0: i32) -> (i32, i32) {
    %c0_i32 = arith.constant 0 : i32
    %c0_i32_0 = arith.constant 0 : i32
    %c0_i32_1 = arith.constant 0 : i32
    return %c0_i32, %c0_i32_0 : i32, i32
  }
  func.func @transform_11(%arg0: i32) -> (i32, i32) {
    %c0_i32 = arith.constant 0 : i32
    %c0_i32_0 = arith.constant 0 : i32
    %c0_i32_1 = arith.constant 0 : i32
    return %c0_i32, %c0_i32_0 : i32, i32
  }
  func.func @transform_12(%arg0: i32) -> (i32, i32) {
    %c0_i32 = arith.constant 0 : i32
    %c0_i32_0 = arith.constant 0 : i32
    %c0_i32_1 = arith.constant 0 : i32
    return %c0_i32, %c0_i32_0 : i32, i32
  }
  func.func @transform_13(%arg0: i32) -> (i32, i32) {
    %c0_i32 = arith.constant 0 : i32
    %c0_i32_0 = arith.constant 0 : i32
    %c0_i32_1 = arith.constant 0 : i32
    return %c0_i32, %c0_i32_0 : i32, i32
  }
  func.func @transform_14(%arg0: i32) -> (i32, i32) {
    %c0_i32 = arith.constant 0 : i32
    %c0_i32_0 = arith.constant 0 : i32
    %c0_i32_1 = arith.constant 0 : i32
    return %c0_i32, %c0_i32_0 : i32, i32
  }
  func.func @transform_15(%arg0: i32) -> (i32, i32) {
    %c0_i32 = arith.constant 0 : i32
    %c0_i32_0 = arith.constant 0 : i32
    %c0_i32_1 = arith.constant 0 : i32
    return %c0_i32, %c0_i32_0 : i32, i32
  }
  func.func @transform_16(%arg0: i32) -> (i32, i32, i32) {
    %c0_i32 = arith.constant 0 : i32
    %c0_i32_0 = arith.constant 0 : i32
    %c0_i32_1 = arith.constant 0 : i32
    return %arg0, %c0_i32, %c0_i32_0 : i32, i32, i32
  }
}

module attributes {stable_mosaic.version = 11 : i64} {
  func.func @_encoder_layer_kernel(%arg0: i32, %arg1: memref<1x8x32xf32, #tpu.memory_space<vmem>>, %arg2: memref<1x1x8xf32, #tpu.memory_space<vmem>>, %arg3: memref<1x32xf32, #tpu.memory_space<vmem>>, %arg4: memref<1x32xf32, #tpu.memory_space<vmem>>, %arg5: memref<32x96xbf16, #tpu.memory_space<vmem>>, %arg6: memref<1x96xf32, #tpu.memory_space<vmem>>, %arg7: memref<32x32xbf16, #tpu.memory_space<vmem>>, %arg8: memref<1x32xf32, #tpu.memory_space<vmem>>, %arg9: memref<1x32xf32, #tpu.memory_space<vmem>>, %arg10: memref<1x32xf32, #tpu.memory_space<vmem>>, %arg11: memref<32x64xbf16, #tpu.memory_space<vmem>>, %arg12: memref<1x64xf32, #tpu.memory_space<vmem>>, %arg13: memref<64x32xbf16, #tpu.memory_space<vmem>>, %arg14: memref<1x32xf32, #tpu.memory_space<vmem>>, %arg15: memref<1x32xf32, #tpu.memory_space<vmem>>, %arg16: memref<1x32xf32, #tpu.memory_space<vmem>>, %arg17: memref<1x8x32xbf16, #tpu.memory_space<vmem>>) attributes {dimension_semantics = [#tpu.dimension_semantics<parallel>], iteration_bounds = array<i64: 2>, scalar_prefetch = 0 : i64, scratch_operands = 0 : i64, tpu.core_type = #tpu.core_type<tc>, window_params = [{transform_indices = @transform_0, window_bounds = array<i64: 1, 8, 32>}, {transform_indices = @transform_1, window_bounds = array<i64: 1, 1, 8>}, {pipeline_mode = #tpu.pipeline_mode<synchronous>, transform_indices = @transform_2, window_bounds = array<i64: 1, 32>}, {pipeline_mode = #tpu.pipeline_mode<synchronous>, transform_indices = @transform_3, window_bounds = array<i64: 1, 32>}, {pipeline_mode = #tpu.pipeline_mode<synchronous>, transform_indices = @transform_4, window_bounds = array<i64: 32, 96>}, {pipeline_mode = #tpu.pipeline_mode<synchronous>, transform_indices = @transform_5, window_bounds = array<i64: 1, 96>}, {pipeline_mode = #tpu.pipeline_mode<synchronous>, transform_indices = @transform_6, window_bounds = array<i64: 32, 32>}, {pipeline_mode = #tpu.pipeline_mode<synchronous>, transform_indices = @transform_7, window_bounds = array<i64: 1, 32>}, {pipeline_mode = #tpu.pipeline_mode<synchronous>, transform_indices = @transform_8, window_bounds = array<i64: 1, 32>}, {pipeline_mode = #tpu.pipeline_mode<synchronous>, transform_indices = @transform_9, window_bounds = array<i64: 1, 32>}, {pipeline_mode = #tpu.pipeline_mode<synchronous>, transform_indices = @transform_10, window_bounds = array<i64: 32, 64>}, {pipeline_mode = #tpu.pipeline_mode<synchronous>, transform_indices = @transform_11, window_bounds = array<i64: 1, 64>}, {pipeline_mode = #tpu.pipeline_mode<synchronous>, transform_indices = @transform_12, window_bounds = array<i64: 64, 32>}, {pipeline_mode = #tpu.pipeline_mode<synchronous>, transform_indices = @transform_13, window_bounds = array<i64: 1, 32>}, {pipeline_mode = #tpu.pipeline_mode<synchronous>, transform_indices = @transform_14, window_bounds = array<i64: 1, 32>}, {pipeline_mode = #tpu.pipeline_mode<synchronous>, transform_indices = @transform_15, window_bounds = array<i64: 1, 32>}, {transform_indices = @transform_16, window_bounds = array<i64: 1, 8, 32>}]} {
    %c0 = arith.constant 0 : index
    %c0_0 = arith.constant 0 : index
    %c0_1 = arith.constant 0 : index
    %0 = vector.load %arg1[%c0, %c0_0, %c0_1] : memref<1x8x32xf32, #tpu.memory_space<vmem>>, vector<1x8x32xf32>
    %1 = vector.shape_cast %0 : vector<1x8x32xf32> to vector<8x32xf32>
    %c0_2 = arith.constant 0 : index
    %c0_3 = arith.constant 0 : index
    %2 = vector.load %arg3[%c0_2, %c0_3] : memref<1x32xf32, #tpu.memory_space<vmem>>, vector<1x32xf32>
    %c0_4 = arith.constant 0 : index
    %c0_5 = arith.constant 0 : index
    %3 = vector.load %arg4[%c0_4, %c0_5] : memref<1x32xf32, #tpu.memory_space<vmem>>, vector<1x32xf32>
    %cst = arith.constant dense<0.000000e+00> : vector<8xf32>
    %4 = vector.multi_reduction <add>, %1, %cst [1] : vector<8x32xf32> to vector<8xf32>
    %5 = vector.shape_cast %4 : vector<8xf32> to vector<8x1xf32>
    %cst_6 = arith.constant 3.200000e+01 : f32
    %6 = vector.broadcast %cst_6 : f32 to vector<8x1xf32>
    %7 = arith.divf %5, %6 : vector<8x1xf32>
    %8 = vector.broadcast %7 : vector<8x1xf32> to vector<8x32xf32>
    %9 = arith.subf %1, %8 : vector<8x32xf32>
    %10 = arith.mulf %9, %9 : vector<8x32xf32>
    %cst_7 = arith.constant dense<0.000000e+00> : vector<8xf32>
    %11 = vector.multi_reduction <add>, %10, %cst_7 [1] : vector<8x32xf32> to vector<8xf32>
    %12 = vector.shape_cast %11 : vector<8xf32> to vector<8x1xf32>
    %cst_8 = arith.constant 3.200000e+01 : f32
    %13 = vector.broadcast %cst_8 : f32 to vector<8x1xf32>
    %14 = arith.divf %12, %13 : vector<8x1xf32>
    %15 = vector.broadcast %7 : vector<8x1xf32> to vector<8x32xf32>
    %16 = arith.subf %1, %15 : vector<8x32xf32>
    %cst_9 = arith.constant 9.99999996E-13 : f32
    %17 = vector.broadcast %cst_9 : f32 to vector<8x1xf32>
    %18 = arith.addf %14, %17 : vector<8x1xf32>
    %19 = math.rsqrt %18 : vector<8x1xf32>
    %20 = vector.broadcast %19 : vector<8x1xf32> to vector<8x32xf32>
    %21 = arith.mulf %16, %20 : vector<8x32xf32>
    %22 = vector.broadcast %2 : vector<1x32xf32> to vector<8x32xf32>
    %23 = arith.mulf %21, %22 : vector<8x32xf32>
    %24 = vector.broadcast %3 : vector<1x32xf32> to vector<8x32xf32>
    %25 = arith.addf %23, %24 : vector<8x32xf32>
    %c0_10 = arith.constant 0 : index
    %c0_11 = arith.constant 0 : index
    %c0_12 = arith.constant 0 : index
    %26 = vector.load %arg2[%c0_10, %c0_11, %c0_12] : memref<1x1x8xf32, #tpu.memory_space<vmem>>, vector<1x1x8xf32>
    %27 = vector.shape_cast %26 : vector<1x1x8xf32> to vector<1x8xf32>
    %cst_13 = arith.constant 1.000000e+00 : f32
    %28 = vector.broadcast %cst_13 : f32 to vector<1x8xf32>
    %29 = arith.subf %28, %27 : vector<1x8xf32>
    %cst_14 = arith.constant -1.000000e+09 : f32
    %30 = vector.broadcast %cst_14 : f32 to vector<1x8xf32>
    %31 = arith.mulf %29, %30 : vector<1x8xf32>
    %32 = arith.truncf %25 : vector<8x32xf32> to vector<8x32xbf16>
    %c0_15 = arith.constant 0 : index
    %c0_16 = arith.constant 0 : index
    %33 = vector.load %arg5[%c0_15, %c0_16] : memref<32x96xbf16, #tpu.memory_space<vmem>>, vector<32x96xbf16>
    %cst_17 = arith.constant dense<0.000000e+00> : vector<8x96xf32>
    %34 = tpu.matmul %32, %33, %cst_17 {dimension_numbers = #tpu.dot_dimension_numbers<[1], [0], [0], [1], [0, 0, 1, 1], [], []>} : vector<8x32xbf16>, vector<32x96xbf16>, vector<8x96xf32> -> vector<8x96xf32>
    %c0_18 = arith.constant 0 : index
    %c0_19 = arith.constant 0 : index
    %35 = vector.load %arg6[%c0_18, %c0_19] : memref<1x96xf32, #tpu.memory_space<vmem>>, vector<1x96xf32>
    %36 = vector.broadcast %35 : vector<1x96xf32> to vector<8x96xf32>
    %37 = arith.addf %34, %36 : vector<8x96xf32>
    %38 = arith.truncf %37 : vector<8x96xf32> to vector<8x96xbf16>
    %39 = vector.extract_strided_slice %38 {offsets = [0, 0], sizes = [8, 8], strides = [1, 1]} : vector<8x96xbf16> to vector<8x8xbf16>
    %40 = vector.extract_strided_slice %38 {offsets = [0, 32], sizes = [8, 8], strides = [1, 1]} : vector<8x96xbf16> to vector<8x8xbf16>
    %41 = vector.extract_strided_slice %38 {offsets = [0, 64], sizes = [8, 8], strides = [1, 1]} : vector<8x96xbf16> to vector<8x8xbf16>
    %cst_20 = arith.constant dense<0.000000e+00> : vector<8x8xf32>
    %42 = tpu.matmul %39, %40, %cst_20 {dimension_numbers = #tpu.dot_dimension_numbers<[1], [1], [0], [0], [0, 0, 1, 0], [], []>} : vector<8x8xbf16>, vector<8x8xbf16>, vector<8x8xf32> -> vector<8x8xf32>
    %cst_21 = arith.constant 0.353553385 : f32
    %43 = vector.broadcast %cst_21 : f32 to vector<8x8xf32>
    %44 = arith.mulf %42, %43 : vector<8x8xf32>
    %45 = vector.broadcast %31 : vector<1x8xf32> to vector<8x8xf32>
    %46 = arith.addf %44, %45 : vector<8x8xf32>
    %cst_22 = arith.constant dense<0xFF800000> : vector<8xf32>
    %47 = vector.multi_reduction <maximumf>, %46, %cst_22 [1] : vector<8x8xf32> to vector<8xf32>
    %48 = vector.shape_cast %47 : vector<8xf32> to vector<8x1xf32>
    %49 = vector.broadcast %48 : vector<8x1xf32> to vector<8x8xf32>
    %50 = arith.subf %46, %49 : vector<8x8xf32>
    %51 = math.exp %50 : vector<8x8xf32>
    %cst_23 = arith.constant dense<0.000000e+00> : vector<8xf32>
    %52 = vector.multi_reduction <add>, %51, %cst_23 [1] : vector<8x8xf32> to vector<8xf32>
    %53 = vector.shape_cast %52 : vector<8xf32> to vector<8x1xf32>
    %54 = tpu.reciprocal %53 {approx = true} : vector<8x1xf32> -> vector<8x1xf32>
    %55 = vector.broadcast %54 : vector<8x1xf32> to vector<8x8xf32>
    %56 = arith.mulf %51, %55 : vector<8x8xf32>
    %57 = arith.truncf %56 : vector<8x8xf32> to vector<8x8xbf16>
    %cst_24 = arith.constant dense<0.000000e+00> : vector<8x8xf32>
    %58 = tpu.matmul %57, %41, %cst_24 {dimension_numbers = #tpu.dot_dimension_numbers<[1], [0], [0], [1], [0, 0, 1, 1], [], []>} : vector<8x8xbf16>, vector<8x8xbf16>, vector<8x8xf32> -> vector<8x8xf32>
    %59 = vector.extract_strided_slice %38 {offsets = [0, 8], sizes = [8, 8], strides = [1, 1]} : vector<8x96xbf16> to vector<8x8xbf16>
    %60 = vector.extract_strided_slice %38 {offsets = [0, 40], sizes = [8, 8], strides = [1, 1]} : vector<8x96xbf16> to vector<8x8xbf16>
    %61 = vector.extract_strided_slice %38 {offsets = [0, 72], sizes = [8, 8], strides = [1, 1]} : vector<8x96xbf16> to vector<8x8xbf16>
    %cst_25 = arith.constant dense<0.000000e+00> : vector<8x8xf32>
    %62 = tpu.matmul %59, %60, %cst_25 {dimension_numbers = #tpu.dot_dimension_numbers<[1], [1], [0], [0], [0, 0, 1, 0], [], []>} : vector<8x8xbf16>, vector<8x8xbf16>, vector<8x8xf32> -> vector<8x8xf32>
    %cst_26 = arith.constant 0.353553385 : f32
    %63 = vector.broadcast %cst_26 : f32 to vector<8x8xf32>
    %64 = arith.mulf %62, %63 : vector<8x8xf32>
    %65 = vector.broadcast %31 : vector<1x8xf32> to vector<8x8xf32>
    %66 = arith.addf %64, %65 : vector<8x8xf32>
    %cst_27 = arith.constant dense<0xFF800000> : vector<8xf32>
    %67 = vector.multi_reduction <maximumf>, %66, %cst_27 [1] : vector<8x8xf32> to vector<8xf32>
    %68 = vector.shape_cast %67 : vector<8xf32> to vector<8x1xf32>
    %69 = vector.broadcast %68 : vector<8x1xf32> to vector<8x8xf32>
    %70 = arith.subf %66, %69 : vector<8x8xf32>
    %71 = math.exp %70 : vector<8x8xf32>
    %cst_28 = arith.constant dense<0.000000e+00> : vector<8xf32>
    %72 = vector.multi_reduction <add>, %71, %cst_28 [1] : vector<8x8xf32> to vector<8xf32>
    %73 = vector.shape_cast %72 : vector<8xf32> to vector<8x1xf32>
    %74 = tpu.reciprocal %73 {approx = true} : vector<8x1xf32> -> vector<8x1xf32>
    %75 = vector.broadcast %74 : vector<8x1xf32> to vector<8x8xf32>
    %76 = arith.mulf %71, %75 : vector<8x8xf32>
    %77 = arith.truncf %76 : vector<8x8xf32> to vector<8x8xbf16>
    %cst_29 = arith.constant dense<0.000000e+00> : vector<8x8xf32>
    %78 = tpu.matmul %77, %61, %cst_29 {dimension_numbers = #tpu.dot_dimension_numbers<[1], [0], [0], [1], [0, 0, 1, 1], [], []>} : vector<8x8xbf16>, vector<8x8xbf16>, vector<8x8xf32> -> vector<8x8xf32>
    %79 = vector.extract_strided_slice %38 {offsets = [0, 16], sizes = [8, 8], strides = [1, 1]} : vector<8x96xbf16> to vector<8x8xbf16>
    %80 = vector.extract_strided_slice %38 {offsets = [0, 48], sizes = [8, 8], strides = [1, 1]} : vector<8x96xbf16> to vector<8x8xbf16>
    %81 = vector.extract_strided_slice %38 {offsets = [0, 80], sizes = [8, 8], strides = [1, 1]} : vector<8x96xbf16> to vector<8x8xbf16>
    %cst_30 = arith.constant dense<0.000000e+00> : vector<8x8xf32>
    %82 = tpu.matmul %79, %80, %cst_30 {dimension_numbers = #tpu.dot_dimension_numbers<[1], [1], [0], [0], [0, 0, 1, 0], [], []>} : vector<8x8xbf16>, vector<8x8xbf16>, vector<8x8xf32> -> vector<8x8xf32>
    %cst_31 = arith.constant 0.353553385 : f32
    %83 = vector.broadcast %cst_31 : f32 to vector<8x8xf32>
    %84 = arith.mulf %82, %83 : vector<8x8xf32>
    %85 = vector.broadcast %31 : vector<1x8xf32> to vector<8x8xf32>
    %86 = arith.addf %84, %85 : vector<8x8xf32>
    %cst_32 = arith.constant dense<0xFF800000> : vector<8xf32>
    %87 = vector.multi_reduction <maximumf>, %86, %cst_32 [1] : vector<8x8xf32> to vector<8xf32>
    %88 = vector.shape_cast %87 : vector<8xf32> to vector<8x1xf32>
    %89 = vector.broadcast %88 : vector<8x1xf32> to vector<8x8xf32>
    %90 = arith.subf %86, %89 : vector<8x8xf32>
    %91 = math.exp %90 : vector<8x8xf32>
    %cst_33 = arith.constant dense<0.000000e+00> : vector<8xf32>
    %92 = vector.multi_reduction <add>, %91, %cst_33 [1] : vector<8x8xf32> to vector<8xf32>
    %93 = vector.shape_cast %92 : vector<8xf32> to vector<8x1xf32>
    %94 = tpu.reciprocal %93 {approx = true} : vector<8x1xf32> -> vector<8x1xf32>
    %95 = vector.broadcast %94 : vector<8x1xf32> to vector<8x8xf32>
    %96 = arith.mulf %91, %95 : vector<8x8xf32>
    %97 = arith.truncf %96 : vector<8x8xf32> to vector<8x8xbf16>
    %cst_34 = arith.constant dense<0.000000e+00> : vector<8x8xf32>
    %98 = tpu.matmul %97, %81, %cst_34 {dimension_numbers = #tpu.dot_dimension_numbers<[1], [0], [0], [1], [0, 0, 1, 1], [], []>} : vector<8x8xbf16>, vector<8x8xbf16>, vector<8x8xf32> -> vector<8x8xf32>
    %99 = vector.extract_strided_slice %38 {offsets = [0, 24], sizes = [8, 8], strides = [1, 1]} : vector<8x96xbf16> to vector<8x8xbf16>
    %100 = vector.extract_strided_slice %38 {offsets = [0, 56], sizes = [8, 8], strides = [1, 1]} : vector<8x96xbf16> to vector<8x8xbf16>
    %101 = vector.extract_strided_slice %38 {offsets = [0, 88], sizes = [8, 8], strides = [1, 1]} : vector<8x96xbf16> to vector<8x8xbf16>
    %cst_35 = arith.constant dense<0.000000e+00> : vector<8x8xf32>
    %102 = tpu.matmul %99, %100, %cst_35 {dimension_numbers = #tpu.dot_dimension_numbers<[1], [1], [0], [0], [0, 0, 1, 0], [], []>} : vector<8x8xbf16>, vector<8x8xbf16>, vector<8x8xf32> -> vector<8x8xf32>
    %cst_36 = arith.constant 0.353553385 : f32
    %103 = vector.broadcast %cst_36 : f32 to vector<8x8xf32>
    %104 = arith.mulf %102, %103 : vector<8x8xf32>
    %105 = vector.broadcast %31 : vector<1x8xf32> to vector<8x8xf32>
    %106 = arith.addf %104, %105 : vector<8x8xf32>
    %cst_37 = arith.constant dense<0xFF800000> : vector<8xf32>
    %107 = vector.multi_reduction <maximumf>, %106, %cst_37 [1] : vector<8x8xf32> to vector<8xf32>
    %108 = vector.shape_cast %107 : vector<8xf32> to vector<8x1xf32>
    %109 = vector.broadcast %108 : vector<8x1xf32> to vector<8x8xf32>
    %110 = arith.subf %106, %109 : vector<8x8xf32>
    %111 = math.exp %110 : vector<8x8xf32>
    %cst_38 = arith.constant dense<0.000000e+00> : vector<8xf32>
    %112 = vector.multi_reduction <add>, %111, %cst_38 [1] : vector<8x8xf32> to vector<8xf32>
    %113 = vector.shape_cast %112 : vector<8xf32> to vector<8x1xf32>
    %114 = tpu.reciprocal %113 {approx = true} : vector<8x1xf32> -> vector<8x1xf32>
    %115 = vector.broadcast %114 : vector<8x1xf32> to vector<8x8xf32>
    %116 = arith.mulf %111, %115 : vector<8x8xf32>
    %117 = arith.truncf %116 : vector<8x8xf32> to vector<8x8xbf16>
    %cst_39 = arith.constant dense<0.000000e+00> : vector<8x8xf32>
    %118 = tpu.matmul %117, %101, %cst_39 {dimension_numbers = #tpu.dot_dimension_numbers<[1], [0], [0], [1], [0, 0, 1, 1], [], []>} : vector<8x8xbf16>, vector<8x8xbf16>, vector<8x8xf32> -> vector<8x8xf32>
    %119 = tpu.concatenate %58, %78, %98, %118 in 1 : vector<8x8xf32>, vector<8x8xf32>, vector<8x8xf32>, vector<8x8xf32> -> vector<8x32xf32>
    %120 = arith.truncf %119 : vector<8x32xf32> to vector<8x32xbf16>
    %c0_40 = arith.constant 0 : index
    %c0_41 = arith.constant 0 : index
    %121 = vector.load %arg7[%c0_40, %c0_41] : memref<32x32xbf16, #tpu.memory_space<vmem>>, vector<32x32xbf16>
    %cst_42 = arith.constant dense<0.000000e+00> : vector<8x32xf32>
    %122 = tpu.matmul %120, %121, %cst_42 {dimension_numbers = #tpu.dot_dimension_numbers<[1], [0], [0], [1], [0, 0, 1, 1], [], []>} : vector<8x32xbf16>, vector<32x32xbf16>, vector<8x32xf32> -> vector<8x32xf32>
    %c0_43 = arith.constant 0 : index
    %c0_44 = arith.constant 0 : index
    %123 = vector.load %arg8[%c0_43, %c0_44] : memref<1x32xf32, #tpu.memory_space<vmem>>, vector<1x32xf32>
    %124 = vector.broadcast %123 : vector<1x32xf32> to vector<8x32xf32>
    %125 = arith.addf %122, %124 : vector<8x32xf32>
    %126 = arith.addf %125, %25 : vector<8x32xf32>
    %c0_45 = arith.constant 0 : index
    %c0_46 = arith.constant 0 : index
    %127 = vector.load %arg9[%c0_45, %c0_46] : memref<1x32xf32, #tpu.memory_space<vmem>>, vector<1x32xf32>
    %c0_47 = arith.constant 0 : index
    %c0_48 = arith.constant 0 : index
    %128 = vector.load %arg10[%c0_47, %c0_48] : memref<1x32xf32, #tpu.memory_space<vmem>>, vector<1x32xf32>
    %cst_49 = arith.constant dense<0.000000e+00> : vector<8xf32>
    %129 = vector.multi_reduction <add>, %126, %cst_49 [1] : vector<8x32xf32> to vector<8xf32>
    %130 = vector.shape_cast %129 : vector<8xf32> to vector<8x1xf32>
    %cst_50 = arith.constant 3.200000e+01 : f32
    %131 = vector.broadcast %cst_50 : f32 to vector<8x1xf32>
    %132 = arith.divf %130, %131 : vector<8x1xf32>
    %133 = vector.broadcast %132 : vector<8x1xf32> to vector<8x32xf32>
    %134 = arith.subf %126, %133 : vector<8x32xf32>
    %135 = arith.mulf %134, %134 : vector<8x32xf32>
    %cst_51 = arith.constant dense<0.000000e+00> : vector<8xf32>
    %136 = vector.multi_reduction <add>, %135, %cst_51 [1] : vector<8x32xf32> to vector<8xf32>
    %137 = vector.shape_cast %136 : vector<8xf32> to vector<8x1xf32>
    %cst_52 = arith.constant 3.200000e+01 : f32
    %138 = vector.broadcast %cst_52 : f32 to vector<8x1xf32>
    %139 = arith.divf %137, %138 : vector<8x1xf32>
    %140 = vector.broadcast %132 : vector<8x1xf32> to vector<8x32xf32>
    %141 = arith.subf %126, %140 : vector<8x32xf32>
    %cst_53 = arith.constant 9.99999996E-13 : f32
    %142 = vector.broadcast %cst_53 : f32 to vector<8x1xf32>
    %143 = arith.addf %139, %142 : vector<8x1xf32>
    %144 = math.rsqrt %143 : vector<8x1xf32>
    %145 = vector.broadcast %144 : vector<8x1xf32> to vector<8x32xf32>
    %146 = arith.mulf %141, %145 : vector<8x32xf32>
    %147 = vector.broadcast %127 : vector<1x32xf32> to vector<8x32xf32>
    %148 = arith.mulf %146, %147 : vector<8x32xf32>
    %149 = vector.broadcast %128 : vector<1x32xf32> to vector<8x32xf32>
    %150 = arith.addf %148, %149 : vector<8x32xf32>
    %151 = arith.truncf %150 : vector<8x32xf32> to vector<8x32xbf16>
    %c0_54 = arith.constant 0 : index
    %c0_55 = arith.constant 0 : index
    %152 = vector.load %arg11[%c0_54, %c0_55] : memref<32x64xbf16, #tpu.memory_space<vmem>>, vector<32x64xbf16>
    %cst_56 = arith.constant dense<0.000000e+00> : vector<8x64xf32>
    %153 = tpu.matmul %151, %152, %cst_56 {dimension_numbers = #tpu.dot_dimension_numbers<[1], [0], [0], [1], [0, 0, 1, 1], [], []>} : vector<8x32xbf16>, vector<32x64xbf16>, vector<8x64xf32> -> vector<8x64xf32>
    %c0_57 = arith.constant 0 : index
    %c0_58 = arith.constant 0 : index
    %154 = vector.load %arg12[%c0_57, %c0_58] : memref<1x64xf32, #tpu.memory_space<vmem>>, vector<1x64xf32>
    %155 = vector.broadcast %154 : vector<1x64xf32> to vector<8x64xf32>
    %156 = arith.addf %153, %155 : vector<8x64xf32>
    %cst_59 = arith.constant 5.000000e-01 : f32
    %157 = vector.broadcast %cst_59 : f32 to vector<8x64xf32>
    %158 = arith.mulf %157, %156 : vector<8x64xf32>
    %cst_60 = arith.constant 0.707106769 : f32
    %159 = vector.broadcast %cst_60 : f32 to vector<8x64xf32>
    %160 = arith.mulf %156, %159 : vector<8x64xf32>
    %161 = math.erf %160 : vector<8x64xf32>
    %cst_61 = arith.constant 1.000000e+00 : f32
    %162 = vector.broadcast %cst_61 : f32 to vector<8x64xf32>
    %163 = arith.addf %162, %161 : vector<8x64xf32>
    %164 = arith.mulf %158, %163 : vector<8x64xf32>
    %165 = arith.truncf %164 : vector<8x64xf32> to vector<8x64xbf16>
    %c0_62 = arith.constant 0 : index
    %c0_63 = arith.constant 0 : index
    %166 = vector.load %arg13[%c0_62, %c0_63] : memref<64x32xbf16, #tpu.memory_space<vmem>>, vector<64x32xbf16>
    %cst_64 = arith.constant dense<0.000000e+00> : vector<8x32xf32>
    %167 = tpu.matmul %165, %166, %cst_64 {dimension_numbers = #tpu.dot_dimension_numbers<[1], [0], [0], [1], [0, 0, 1, 1], [], []>} : vector<8x64xbf16>, vector<64x32xbf16>, vector<8x32xf32> -> vector<8x32xf32>
    %c0_65 = arith.constant 0 : index
    %c0_66 = arith.constant 0 : index
    %168 = vector.load %arg14[%c0_65, %c0_66] : memref<1x32xf32, #tpu.memory_space<vmem>>, vector<1x32xf32>
    %169 = vector.broadcast %168 : vector<1x32xf32> to vector<8x32xf32>
    %170 = arith.addf %167, %169 : vector<8x32xf32>
    %171 = arith.addf %170, %150 : vector<8x32xf32>
    %c0_67 = arith.constant 0 : index
    %c0_68 = arith.constant 0 : index
    %172 = vector.load %arg15[%c0_67, %c0_68] : memref<1x32xf32, #tpu.memory_space<vmem>>, vector<1x32xf32>
    %c0_69 = arith.constant 0 : index
    %c0_70 = arith.constant 0 : index
    %173 = vector.load %arg16[%c0_69, %c0_70] : memref<1x32xf32, #tpu.memory_space<vmem>>, vector<1x32xf32>
    %cst_71 = arith.constant dense<0.000000e+00> : vector<8xf32>
    %174 = vector.multi_reduction <add>, %171, %cst_71 [1] : vector<8x32xf32> to vector<8xf32>
    %175 = vector.shape_cast %174 : vector<8xf32> to vector<8x1xf32>
    %cst_72 = arith.constant 3.200000e+01 : f32
    %176 = vector.broadcast %cst_72 : f32 to vector<8x1xf32>
    %177 = arith.divf %175, %176 : vector<8x1xf32>
    %178 = vector.broadcast %177 : vector<8x1xf32> to vector<8x32xf32>
    %179 = arith.subf %171, %178 : vector<8x32xf32>
    %180 = arith.mulf %179, %179 : vector<8x32xf32>
    %cst_73 = arith.constant dense<0.000000e+00> : vector<8xf32>
    %181 = vector.multi_reduction <add>, %180, %cst_73 [1] : vector<8x32xf32> to vector<8xf32>
    %182 = vector.shape_cast %181 : vector<8xf32> to vector<8x1xf32>
    %cst_74 = arith.constant 3.200000e+01 : f32
    %183 = vector.broadcast %cst_74 : f32 to vector<8x1xf32>
    %184 = arith.divf %182, %183 : vector<8x1xf32>
    %185 = vector.broadcast %177 : vector<8x1xf32> to vector<8x32xf32>
    %186 = arith.subf %171, %185 : vector<8x32xf32>
    %cst_75 = arith.constant 9.99999996E-13 : f32
    %187 = vector.broadcast %cst_75 : f32 to vector<8x1xf32>
    %188 = arith.addf %184, %187 : vector<8x1xf32>
    %189 = math.rsqrt %188 : vector<8x1xf32>
    %190 = vector.broadcast %189 : vector<8x1xf32> to vector<8x32xf32>
    %191 = arith.mulf %186, %190 : vector<8x32xf32>
    %192 = vector.broadcast %172 : vector<1x32xf32> to vector<8x32xf32>
    %193 = arith.mulf %191, %192 : vector<8x32xf32>
    %194 = vector.broadcast %173 : vector<1x32xf32> to vector<8x32xf32>
    %195 = arith.addf %193, %194 : vector<8x32xf32>
    %196 = vector.shape_cast %195 : vector<8x32xf32> to vector<1x8x32xf32>
    %197 = arith.truncf %196 : vector<1x8x32xf32> to vector<1x8x32xbf16>
    %c0_76 = arith.constant 0 : index
    %c0_77 = arith.constant 0 : index
    %c0_78 = arith.constant 0 : index
    %198 = vector.load %arg17[%c0_76, %c0_77, %c0_78] : memref<1x8x32xbf16, #tpu.memory_space<vmem>>, vector<1x8x32xbf16>
    tpu.vector_store %arg17[%c0_76, %c0_77, %c0_78], %197 {strides = array<i32>} : memref<1x8x32xbf16, #tpu.memory_space<vmem>>, vector<1x8x32xbf16>,
    return
  }
  func.func @transform_0(%arg0: i32) -> (i32, i32, i32) {
    %c0_i32 = arith.constant 0 : i32
    %c0_i32_0 = arith.constant 0 : i32
    %c0_i32_1 = arith.constant 0 : i32
    return %arg0, %c0_i32, %c0_i32_0 : i32, i32, i32
  }
  func.func @transform_1(%arg0: i32) -> (i32, i32, i32) {
    %c0_i32 = arith.constant 0 : i32
    %c0_i32_0 = arith.constant 0 : i32
    %c0_i32_1 = arith.constant 0 : i32
    return %arg0, %c0_i32, %c0_i32_0 : i32, i32, i32
  }
  func.func @transform_2(%arg0: i32) -> (i32, i32) {
    %c0_i32 = arith.constant 0 : i32
    %c0_i32_0 = arith.constant 0 : i32
    %c0_i32_1 = arith.constant 0 : i32
    return %c0_i32, %c0_i32_0 : i32, i32
  }
  func.func @transform_3(%arg0: i32) -> (i32, i32) {
    %c0_i32 = arith.constant 0 : i32
    %c0_i32_0 = arith.constant 0 : i32
    %c0_i32_1 = arith.constant 0 : i32
    return %c0_i32, %c0_i32_0 : i32, i32
  }
  func.func @transform_4(%arg0: i32) -> (i32, i32) {
    %c0_i32 = arith.constant 0 : i32
    %c0_i32_0 = arith.constant 0 : i32
    %c0_i32_1 = arith.constant 0 : i32
    return %c0_i32, %c0_i32_0 : i32, i32
  }
  func.func @transform_5(%arg0: i32) -> (i32, i32) {
    %c0_i32 = arith.constant 0 : i32
    %c0_i32_0 = arith.constant 0 : i32
    %c0_i32_1 = arith.constant 0 : i32
    return %c0_i32, %c0_i32_0 : i32, i32
  }
  func.func @transform_6(%arg0: i32) -> (i32, i32) {
    %c0_i32 = arith.constant 0 : i32
    %c0_i32_0 = arith.constant 0 : i32
    %c0_i32_1 = arith.constant 0 : i32
    return %c0_i32, %c0_i32_0 : i32, i32
  }
  func.func @transform_7(%arg0: i32) -> (i32, i32) {
    %c0_i32 = arith.constant 0 : i32
    %c0_i32_0 = arith.constant 0 : i32
    %c0_i32_1 = arith.constant 0 : i32
    return %c0_i32, %c0_i32_0 : i32, i32
  }
  func.func @transform_8(%arg0: i32) -> (i32, i32) {
    %c0_i32 = arith.constant 0 : i32
    %c0_i32_0 = arith.constant 0 : i32
    %c0_i32_1 = arith.constant 0 : i32
    return %c0_i32, %c0_i32_0 : i32, i32
  }
  func.func @transform_9(%arg0: i32) -> (i32, i32) {
    %c0_i32 = arith.constant 0 : i32
    %c0_i32_0 = arith.constant 0 : i32
    %c0_i32_1 = arith.constant 0 : i32
    return %c0_i32, %c0_i32_0 : i32, i32
  }
  func.func @transform_10(%arg0: i32) -> (i32, i32) {
    %c0_i32 = arith.constant 0 : i32
    %c0_i32_0 = arith.constant 0 : i32
    %c0_i32_1 = arith.constant 0 : i32
    return %c0_i32, %c0_i32_0 : i32, i32
  }
  func.func @transform_11(%arg0: i32) -> (i32, i32) {
    %c0_i32 = arith.constant 0 : i32
    %c0_i32_0 = arith.constant 0 : i32
    %c0_i32_1 = arith.constant 0 : i32
    return %c0_i32, %c0_i32_0 : i32, i32
  }
  func.func @transform_12(%arg0: i32) -> (i32, i32) {
    %c0_i32 = arith.constant 0 : i32
    %c0_i32_0 = arith.constant 0 : i32
    %c0_i32_1 = arith.constant 0 : i32
    return %c0_i32, %c0_i32_0 : i32, i32
  }
  func.func @transform_13(%arg0: i32) -> (i32, i32) {
    %c0_i32 = arith.constant 0 : i32
    %c0_i32_0 = arith.constant 0 : i32
    %c0_i32_1 = arith.constant 0 : i32
    return %c0_i32, %c0_i32_0 : i32, i32
  }
  func.func @transform_14(%arg0: i32) -> (i32, i32) {
    %c0_i32 = arith.constant 0 : i32
    %c0_i32_0 = arith.constant 0 : i32
    %c0_i32_1 = arith.constant 0 : i32
    return %c0_i32, %c0_i32_0 : i32, i32
  }
  func.func @transform_15(%arg0: i32) -> (i32, i32) {
    %c0_i32 = arith.constant 0 : i32
    %c0_i32_0 = arith.constant 0 : i32
    %c0_i32_1 = arith.constant 0 : i32
    return %c0_i32, %c0_i32_0 : i32, i32
  }
  func.func @transform_16(%arg0: i32) -> (i32, i32, i32) {
    %c0_i32 = arith.constant 0 : i32
    %c0_i32_0 = arith.constant 0 : i32
    %c0_i32_1 = arith.constant 0 : i32
    return %arg0, %c0_i32, %c0_i32_0 : i32, i32, i32
  }
}

</mosaic_0001>

<bundles_post_ra>
// kernel: bert_forward.5
= control target key start
LH: loop header
LB: loop body
LE: loop exit
PB: predicated region body
PF: predicated region fallthrough
CT: control target
= control target key end

     0   :  { %14 = vsyncpa [#allocation3], 0  ;;  %v381_v1 = vmov 0.0   ;;  %vm382_vm0 = vmmov 0   ;;  %s501_s0 = inlined_call_operand.vmem [shape: bf16[2,8,32], index: 0, kind: input, shape index: {}]   ;;  %s502_s1 = inlined_call_operand.vmem [shape: bf16[32,32], index: 1, kind: input, shape index: {}]   ;;  %s503_s2 = inlined_call_operand.vmem [shape: f32[1,32], index: 2, kind: input, shape index: {}]   ;;  %s504_s3 = inlined_call_operand.vmem [shape: bf16[32,3], index: 3, kind: input, shape index: {}]   ;;  %s505_s4 = inlined_call_operand.vmem [shape: f32[1,3], index: 4, kind: input, shape index: {}]   ;;  %s506_s5 = inlined_call_operand.vmem [shape: f32[2,3], index: 5, kind: input, shape index: {}]   ;;  %s507_s6 = inlined_call_operand.hbm [shape: f32[2,3], index: 6, kind: output, shape index: {0}]   ;;  %s508_s7 = inlined_call_operand.hbm [shape: f32[2,3], index: 7, kind: output, shape index: {1}]   ;;  %s509_s8 = inlined_call_operand.hbm [shape: f32[1,1], index: 8, kind: output, shape index: {2}]  }
   0x1   :  { %v297_v0 = vld [vmem:[%s502_s1] sm:$0xff]   ;;  %274 = vmatprep.subr.bf16.mxu0 %v381_v1  ;;  %v298_v2 = vld [vmem:[%s502_s1 + $0x8] sm:$0xff]   ;;  %282 = vmatprep.subr.bf16.mxu1 %v381_v1 }
   0x2   :  { %275 = vmatpush3.bf16.msra.mxu0 %v297_v0  ;;  %278 = vmatprep.mubr.msk.bf16.mxu0 %vm382_vm0, %v381_v1  ;;  %v299_v3 = vld [vmem:[%s501_s0] ss:$0 sps:$4 sm:$0xff]   ;;  %v300_v4 = vld [vmem:[%s501_s0 + $0x4] ss:$0 sps:$4 sm:$0xff]  }
   0x3   :  { %276 = vmatprep.subr.bf16.mxu0 %v381_v1  ;;  %286 = vmatprep.mubr.msk.bf16.mxu1 %vm382_vm0, %v381_v1  ;;  %v48_v5 = vunpack.c.l.b16 %v299_v3  ;;  %v49_v6 = vunpack.c.l.b16 %v300_v4 }
   0x4   :  { %15 = vsyncpa [#allocation5], 0  ;;  %vm51_vm1 = vcmask 1041409   ;;  %vm66_vm2 = vcmask 261120   ;;  %v301_v10 = vld [vmem:[%s504_s3] sm:$0xff]   ;;  %v302_v11 = vld [vmem:[%s504_s3 + $0x8] sm:$0xff]  }
   0x5   :  { %v50_v7 = vrot.slane %v49_v6, 7  ;;  %283 = vmatpush3.bf16.msra.mxu1 %v301_v10  ;;  %v260_v12 = vld [vmem:[%s503_s2] ss:$0 sm:$0xff]  ;;  %vm178_vm3 = vcmask 17408   ;;  %vm201_vm4 = vcmask 1024   ;;  %s384_s20 = smov [#allocation2]  }
   0x6   :  { %277 = vmatpush3.bf16.msra.mxu0 %v298_v2  ;;  %284 = vmatprep.subr.bf16.mxu1 %v381_v1  ;;  %v264_v20 = vld [vmem:[%s505_s4] ss:$0 sm:$0xff]  ;;  %s383_s4 = smov [#allocation4]   ;;  %s223_s21 = sshll.u32 %s384_s20, 4  ;;  %s224_s21 = int_to_ptr.vmem [resolvable:$true] %s223_s21 }
   0x7   :  { %v52_v8 = vsel %vm51_vm1, %v50_v7, %v48_v5  ;;  %v195_v37 = vld [vmem:[%s506_s5] sm:$0x3]  ;;  %s233_s19 = sshll.u32 %s383_s4, 4  ;;  %s234_s19 = int_to_ptr.vmem [resolvable:$true] %s233_s19 }
   0x8   :  { %v53_v9 = vpack.c.b16 %v52_v8, %v52_v8  ;;  %s311_s22 = scalar_lea.vmem %s234_s19, 32  ;;  %p316_p1 = scmp.lt.s32.totalorder %s234_s19, %s234_s19 }
   0x9   :  { %285 = vmatpush3.bf16.msra.mxu1 %v302_v11  ;;  %p312_p0 = scmp.ne.s32.totalorder %s234_s19, %s311_s22  ;;  %p317_p2 = scmp.lt.s32.totalorder %s311_s22, %s311_s22 }
   0xa   :  { %279 = vmatmul.mubr.msk.bf16.vlgmr.msra.gmra.mrb[0].mxu0 %vm66_vm2, %v53_v9 }
   0xb   :  { %p318_p3 = por %p317_p2, %p316_p1 }
   0xd   :  { %p319_p4 = pnand %p318_p3, %p312_p0 }
  0xdd   :  { %v104_v13 = vpop.f32.mrb[0].mxu0 }
  0xde   :  { %v105_v14 = vadd.f32 %v260_v12, %v104_v13  ;;  %v280_v15 = vpop.f32.mrb[1].mxu0 }
  0xdf   :  { %v107_v16 = vpop.f32.mrb[2].mxu0 }
  0xe0   :  { %303 = vtanh.f32 %v105_v14  ;;  %v281_v17 = vpop.f32.mrb[3].mxu0 }
  0xea   :  { %v304_v18 = vpop.eup %303 }
  0xeb   :  { %v111_v19 = vpack.c.bf16 %v304_v18, %v304_v18 }
  0xed   :  { %287 = vmatmul.mubr.msk.bf16.vlgmr.msra.gmra.mrb[0].mxu1 %vm66_vm2, %v111_v19 }
 0x1c0   :  { %v172_v21 = vpop.f32.mrb[0].mxu1 }
 0x1c1   :  { %v173_v22 = vadd.f32 %v264_v20, %v172_v21  ;;  %v288_v23 = vpop.f32.mrb[1].mxu1 }
 0x1c2   :  { %v175_v24 = vpop.f32.mrb[2].mxu1 }
 0x1c3   :  { %v289_v25 = vpop.f32.mrb[3].mxu1  ;;  %v180_v26 = vsel %vm178_vm3, %v173_v22, -inf  ;;  %179 = vst.msk [vmem:[#allocation2] sm:$0x3] %vm178_vm3, %v173_v22 }
 0x1c4   :  { %181 = vmax.xlane.f32.xlu0 %v180_v26 }
 0x251   :  { %v182_v27 = vpop.xlane.xlu0 %181 }
 0x252   :  { %v183_v28 = vsub.f32 %v173_v22, %v182_v27 }
 0x254   :  { %v184_v29 = vmul.f32 1.442695, %v183_v28 }
 0x256   :  { %305 = vpow2.f32 %v184_v29 }
 0x260   :  { %v306_v30 = vpop.eup %305 }
 0x261   :  { %v186_v31 = vsel %vm178_vm3, %v306_v30, 0.0 }
 0x262   :  { %187 = vadd.xlane.f32.xlu0 %v186_v31 }
 0x2ef   :  { %v188_v32 = vpop.xlane.xlu0 %187 }
 0x2f0   :  { %307 = vrcp.f32 %v188_v32 }
 0x2f1   :  { %309 = vlog2.f32 %v188_v32 }
 0x2fa   :  { %v308_v33 = vpop.eup %307 }
 0x2fb   :  { %v310_v34 = vpop.eup %309  ;;  %v190_v35 = vmul.f32 %v308_v33, %v306_v30 }
 0x2fc   :  { %v193_v36 = vmul.f32 0.6931472, %v310_v34 }
 0x2fd   :  { %191 = vst.msk [vmem:[#allocation4] sm:$0x3] %vm178_vm3, %v190_v35 }
 0x2fe   :  { %v194_v38 = vsub.f32 %v183_v28, %v193_v36 }
 0x300   :  { %v196_v39 = vmul.f32 %v195_v37, %v194_v38 }
 0x302   :  { %v197_v40 = vsel %vm178_vm3, %v196_v39, 0.0 }
 0x303   :  { %198 = vadd.xlane.f32.xlu1 %v197_v40 }
 0x390   :  { %v199_v41 = vpop.xlane.xlu1 %198 }
 0x391   :  { %v200_v42 = vsub.f32 0.0, %v199_v41 }
 0x393   :  { %v202_v43 = vsel %vm201_vm4, %v200_v42, 0.0 }
 0x394   :  { %203 = vadd.xlane.f32.xlu1 %v202_v43 }
 0x395   :  { %322 = shalt.err (!%p319_p4)
}
 0x396   :  { %s323_s24 = scalar_lea.hbm %s508_s7, 32 }
 0x397   :  { %p324_p5 = scmp.ne.s32.totalorder %s508_s7, %s323_s24  ;;  %p327_p6 = scmp.lt.u32.totalorder %s323_s24, %s508_s7 }
 0x399   :  { %p329_p7 = pnand %p327_p6, %p324_p5 }
 0x39b   :  { %332 = shalt.err (!%p329_p7)
}
 0x39c   :  { %236 = dma.vmem_to_hbm [thread:$0]  %s234_s19, 32, %s508_s7, [#allocation5]  }
 0x39d   :  { %s333_s9 = scalar_lea.vmem %s224_s21, 32  ;;  %p338_p9 = scmp.lt.s32.totalorder %s224_s21, %s224_s21 }
 0x39e   :  { %p334_p8 = scmp.ne.s32.totalorder %s224_s21, %s333_s9  ;;  %p339_p10 = scmp.lt.s32.totalorder %s333_s9, %s333_s9 }
 0x3a0   :  { %p340_p11 = por %p339_p10, %p338_p9 }
 0x3a2   :  { %p341_p12 = pnand %p340_p11, %p334_p8 }
 0x3a4   :  { %344 = shalt.err (!%p341_p12)
}
 0x3a5   :  { %s345_s12 = scalar_lea.hbm %s507_s6, 32 }
 0x3a6   :  { %p346_p13 = scmp.ne.s32.totalorder %s507_s6, %s345_s12  ;;  %p349_p0 = scmp.lt.u32.totalorder %s345_s12, %s507_s6 }
 0x3a8   :  { %p351_p1 = pnand %p349_p0, %p346_p13 }
 0x3aa   :  { %354 = shalt.err (!%p351_p1)
}
 0x3ab   :  { %226 = dma.vmem_to_hbm [thread:$0]  %s224_s21, 32, %s507_s6, [#allocation3]   ;;  %vm215_vm5 = vcmask 0  }
 0x3ac   :  { %s385_s16 = smov [#allocation6]  }
 0x3ad   :  { %s243_s17 = sshll.u32 %s385_s16, 4  ;;  %s244_s17 = int_to_ptr.vmem [resolvable:$true] %s243_s17 }
 0x3ae   :  { %s355_s2 = scalar_lea.vmem %s244_s17, 16  ;;  %s359_s3 = scalar_lea.vmem %s244_s17, 32 }
 0x3af   :  { %p356_p2 = scmp.ne.s32.totalorder %s244_s17, %s355_s2  ;;  %p360_p3 = scmp.lt.s32.totalorder %s244_s17, %s244_s17 }
 0x3b0   :  { %p361_p4 = scmp.lt.s32.totalorder %s359_s3, %s355_s2 }
 0x3b2   :  { %p362_p5 = por %p361_p4, %p360_p3 }
 0x3b4   :  { %p363_p6 = pnand %p362_p5, %p356_p2 }
 0x421   :  { %v204_v44 = vpop.xlane.xlu1 %203 }
 0x422   :  { %v205_v45 = vrot.slane %v204_v44, 4 }
 0x424   :  { %v206_v46 = vadd.f32 %v205_v45, %v204_v44 }
 0x426   :  { %v207_v47 = vrot.slane %v206_v46, 2 }
 0x428   :  { %v208_v48 = vadd.f32 %v207_v47, %v206_v46 }
 0x42a   :  { %v209_v49 = vrot.slane %v208_v48, 1 }
 0x42c   :  { %v210_v50 = vadd.f32 %v209_v49, %v208_v48 }
 0x42e   :  { %290 = vpush %v210_v50 }
 0x45f   :  { %s291_s18 = spop %290 }
 0x460   :  { %v212_v51 = vstv %s291_s18 }
 0x461   :  { %v214_v52 = vmul.f32 0.5, %v212_v51 }
 0x463   :  { %216 = vst.msk [vmem:[#allocation6] sm:$0x1] %vm215_vm5, %v214_v52 }
 0x464   :  { %366 = shalt.err (!%p363_p6)
}
 0x465   :  { %s367_s19 = scalar_lea.hbm %s509_s8, 16 }
 0x466   :  { %p368_p7 = scmp.ne.s32.totalorder %s509_s8, %s367_s19  ;;  %p371_p8 = scmp.lt.u32.totalorder %s367_s19, %s509_s8 }
 0x468   :  { %p373_p9 = pnand %p371_p8, %p368_p7 }
 0x46a   :  { %376 = shalt.err (!%p373_p9)
}
 0x46b   :  { %246 = dma.vmem_to_hbm [thread:$0]  %s244_s17, 16, %s509_s8, [#allocation5]  }
 0x46c   :  { %377 = dma.done.wait [#allocation3], 32  }
 0x46d   :  { %378 = vsyncadd [#allocation3], 4294967264 }
 0x46e   :  { %379 = dma.done.wait [#allocation5], 48  }
 0x46f   :  { %380 = vsyncadd [#allocation5], 4294967248 }
 0x470   :  { %256 = vsyncpa [#allocation3], 1 }
 0x471   :  { %257 = vsyncpa [#allocation5], 1 }

// kernel: bert_forward.3
= control target key start
LH: loop header
LB: loop body
LE: loop exit
PB: predicated region body
PF: predicated region fallthrough
CT: control target
= control target key end

     0   :  { %s1777_s21 = smov 0   ;;  %s1957_s0 = inlined_call_operand.vmem [shape: f32[2,8,32], index: 0, kind: input, shape index: {}]   ;;  %s1958_s1 = inlined_call_operand.vmem [shape: f32[2,1,8], index: 1, kind: input, shape index: {}]   ;;  %s1959_s2 = inlined_call_operand.vmem [shape: f32[1,32], index: 2, kind: input, shape index: {}]   ;;  %s1960_s3 = inlined_call_operand.vmem [shape: f32[1,32], index: 3, kind: input, shape index: {}]   ;;  %s1961_s4 = inlined_call_operand.vmem [shape: bf16[32,96], index: 4, kind: input, shape index: {}]   ;;  %s1962_s5 = inlined_call_operand.vmem [shape: f32[1,96], index: 5, kind: input, shape index: {}]   ;;  %s1963_s6 = inlined_call_operand.vmem [shape: bf16[32,32], index: 6, kind: input, shape index: {}]   ;;  %s1964_s7 = inlined_call_operand.vmem [shape: f32[1,32], index: 7, kind: input, shape index: {}]   ;;  %s1965_s8 = inlined_call_operand.vmem [shape: f32[1,32], index: 8, kind: input, shape index: {}]   ;;  %s1966_s9 = inlined_call_operand.vmem [shape: f32[1,32], index: 9, kind: input, shape index: {}]   ;;  %s1967_s10 = inlined_call_operand.vmem [shape: bf16[32,64], index: 10, kind: input, shape index: {}]   ;;  %s1968_s11 = inlined_call_operand.vmem [shape: f32[1,64], index: 11, kind: input, shape index: {}]   ;;  %s1969_s12 = inlined_call_operand.vmem [shape: bf16[64,32], index: 12, kind: input, shape index: {}]   ;;  %s1970_s13 = inlined_call_operand.vmem [shape: f32[1,32], index: 13, kind: input, shape index: {}]   ;;  %s1971_s14 = inlined_call_operand.vmem [shape: f32[1,32], index: 14, kind: input, shape index: {}]   ;;  %s1972_s15 = inlined_call_operand.vmem [shape: f32[1,32], index: 15, kind: input, shape index: {}]   ;;  %s1973_s16 = inlined_call_operand.vmem [shape: bf16[2,8,32], index: 16, kind: output, shape index: {}]  }
   0x1   :  { %1974 = sst [smem:[#allocation2_spill]] %s1957_s0 }
   0x2 LB: > { %s1455_s22 = sadd.s32 4294967295, %s1674_s21   ;;  %p1459_p0 = scmp.ge.s32.totalorder %s1674_s21, 1  ;;  %s1674_s21 = sphi %s1777_s21, %s26_s21  }
   0x3   : > { %p469_p1 = scmp.lt.s32.totalorder %s1674_s21, 3 }
   0x5   : > { %p470_p2 = pnand %p1459_p0, %p469_p1 }
   0x6   : > { %p520_p3 = scmp.lt.s32.totalorder (!%p470_p2), %s1455_s22, 1  ;;  %vm535_vm0 = vcmask (!%p470_p2), 261120   ;;  %s1975_s26 = sld [smem:[#allocation2_spill]] (!%p470_p2)  ;;  %v1634_v7 = vld [vmem:[%s1961_s4] sm:$0xff] (!%p470_p2)   ;;  %v1676_v8 = vmov (!%p470_p2), 0.0   ;;  %v1635_v9 = vld [vmem:[%s1961_s4 + $0x8] sm:$0xff] (!%p470_p2)   ;;  %v687_v38 = vlaneseq (!%p470_p2) }
   0x7   : > { %473 = sbr.rel (%p470_p2) target bundleno = 2891 (0xb4b), region = 84  ;;  %1526 = vmatprep.subr.bf16.mxu0 (!%p470_p2), %v1676_v8  ;;  %1534 = vmatprep.subr.bf16.mxu1 (!%p470_p2), %v1676_v8  ;;  %vm1677_vm1 = vmmov (!%p470_p2), 0   ;;  %v1462_v14 = vld [vmem:[%s1959_s2] ss:$0 sm:$0xff] (!%p470_p2)  ;;  %s1678_s25 = smov (!%p470_p2), 120   ;;  %vm638_vm2 = vcmask (!%p470_p2), 64512  }
   0x8   : > { %1527 = vmatpush3.bf16.msra.mxu0 (!%p470_p2), %v1634_v7  ;;  %1530 = vmatprep.mubr.msk.bf16.mxu0 (!%p470_p2), %vm1677_vm1, %v1676_v8  ;;  %v1463_v16 = vld [vmem:[%s1960_s3] ss:$0 sm:$0xff] (!%p470_p2)  ;;  %s1681_s28 = smov (!%p470_p2), 80   ;;  %s1682_s29 = smov (!%p470_p2), 112   ;;  %v688_v41 = vshrl.u32 (!%p470_p2), %v687_v38, 7  ;;  %vm710_vm3 = vcmask (!%p470_p2), 1043456  }
   0x9   : > { %1528 = vmatprep.subr.bf16.mxu0 (!%p470_p2), %v1676_v8  ;;  %1536 = vmatprep.mubr.msk.bf16.mxu1 (!%p470_p2), %vm1677_vm1, %v1676_v8  ;;  %v1464_v20 = vld [vmem:[%s1962_s5] ss:$0 sm:$0xff] (!%p470_p2)  ;;  %s1683_s30 = smov (!%p470_p2), 72   ;;  %s1684_s0 = smov (!%p470_p2), 104   ;;  %vm1103_vm4 = vcmask (!%p470_p2), 130048   ;;  %vm1105_vm5 = vcmask (!%p470_p2), 195584  }
   0xa   : > { %v689_v43 = vsub.s32 (!%p470_p2), 0, %v688_v41  ;;  %s1685_s20 = smov (!%p470_p2), 64   ;;  %s1687_s24 = smov (!%p470_p2), 48   ;;  %vm1316_vm6 = vcmask (!%p470_p2), 523264   ;;  %vm1391_vm7 = vcmask (!%p470_p2), 257024  }
   0xb   : > { %s1691_s17 = smov (!%p470_p2), 24  }
   0xc   : > { %1529 = vmatpush3.bf16.msra.mxu0 (!%p470_p2), %v1635_v9 }
   0xd   : > { %1540 = vmatprep.subr.bf16.mxu0 (!%p470_p2), %v1676_v8 }
   0xe   : > { %s1977_s22 = smov (!%p520_p3, %s1455_s22), 1 }
   0xf   : > { %s1460_s23 = sshll.u32 %s1977_s22, 3  ;;  %s526_s19 = scalar_lea.vmem %s1958_s1, %s1977_s22 }
  0x10   : > { %s523_s27 = scalar_lea.vmem %s1975_s26, %s1460_s23  ;;  %s1679_s26 = smov 96   ;;  %v564_v39 = vld [vmem:[%s526_s19] sm:$0x1] }
  0x11   : > { %v532_v0 = vld [vmem:[%s523_s27] sm:$0xff]  ;;  %s1680_s27 = smov 88   ;;  %v565_v40 = vsub.f32 1.0, %v564_v39  ;;  %s1686_s23 = smov 56  }
  0x12   : > { %v536_v1 = vsel %vm535_vm0, %v532_v0, 0.0  ;;  %s1461_s18 = sshll.u32 %s1977_s22, 2 }
  0x13   : > { %537 = vadd.xlane.f32.xlu0 %v536_v1  ;;  %v566_v42 = vmul.f32 -1e+09, %v565_v40 }
  0x15   : > { %v690_v44 = vrot.slane %v566_v42, %v689_v43 }
  0xa0   : > { %v538_v2 = vpop.xlane.xlu0 %537 }
  0xa1   : > { %v540_v3 = vmul.f32 0.03125, %v538_v2 }
  0xa3   : > { %v541_v4 = vsub.f32 %v532_v0, %v540_v3 }
  0xa5   : > { %v542_v5 = vmul.f32 %v541_v4, %v541_v4 }
  0xa7   : > { %v543_v6 = vsel %vm535_vm0, %v542_v5, 0.0 }
  0xa8   : > { %544 = vadd.xlane.f32.xlu0 %v543_v6 }
 0x135   : > { %v545_v10 = vpop.xlane.xlu0 %544 }
 0x136   : > { %v546_v11 = vmul.f32 0.03125, %v545_v10 }
 0x138   : > { %v547_v12 = vadd.f32 1e-12, %v546_v11 }
 0x13a   : > { %1644 = vrsqrt.f32 %v547_v12 }
 0x144   : > { %v1645_v13 = vpop.eup %1644 }
 0x145   : > { %v549_v15 = vmul.f32 %v1645_v13, %v541_v4 }
 0x147   : > { %v556_v17 = vmul.f32 %v1462_v14, %v549_v15 }
 0x149   : > { %v1813_v18 = vadd.f32 %v1463_v16, %v556_v17 }
 0x14b   : > { %v567_v19 = vpack.c.bf16 %v1813_v18, %v1813_v18 }
 0x14d   : > { %1531 = vmatmul.mubr.msk.bf16.vlgmr.msra.gmra.mrb[0].mxu0 %vm535_vm0, %v567_v19 }
 0x14e   : > { %1542 = vmatprep.mubr.msk.bf16.mxu0 %vm1677_vm1, %v1676_v8 }
 0x220   : > { %v628_v21 = vpop.f32.mrb[0].mxu0 }
 0x221   : > { %v629_v22 = vadd.f32 %v1464_v20, %v628_v21  ;;  %v1532_v23 = vpop.f32.mrb[1].mxu0 }
 0x222   : > { %v631_v24 = vpop.f32.mrb[2].mxu0 }
 0x223   : > { %v1823_v25 = vpack.c.bf16 %v629_v22, %v629_v22  ;;  %v1533_v26 = vpop.f32.mrb[3].mxu0 }
 0x225   : > { %754 = vrot.lane.b32.xlu0 %v1823_v25, %s1678_s25  ;;  %636 = vrot.lane.b32.xlu1 %v1823_v25, %s1679_s26  ;;  %s1688_s25 = smov 40   ;;  %s1689_s26 = smov 8  }
 0x229   : > { %756 = vrot.lane.b32.xlu1 %v1823_v25, %s1680_s27 }
 0x22d   : > { %868 = vrot.lane.b32.xlu1 %v1823_v25, %s1681_s28 }
 0x231   : > { %866 = vrot.lane.b32.xlu1 %v1823_v25, %s1682_s29 }
 0x235   : > { %980 = vrot.lane.b32.xlu1 %v1823_v25, %s1683_s30 }
 0x239   : > { %978 = vrot.lane.b32.xlu1 %v1823_v25, %s1684_s0  ;;  %s1690_s0 = smov 16  }
 0x297   : > { %v637_v27 = vpop.permute.xlu1 %636  ;;  %v755_v32 = vpop.permute.xlu0 %754 }
 0x298   : > { %v643_v28 = vsel %vm638_vm2, %v637_v27, 0 }
 0x299   : > { %1535 = vmatpush3.bf16.xpose.msra.mxu1 %v643_v28 }
 0x29a   : > { %1546 = vmatprep.subr.bf16.mxu1 %v1676_v8 }
 0x29b   : > { %v757_v29 = vpop.permute.xlu1 %756 }
 0x29c   : > { %v762_v30 = vsel %vm638_vm2, %v757_v29, 0 }
 0x29f   : > { %v869_v31 = vpop.permute.xlu1 %868 }
 0x2a0   : > { %1537 = vmatmul.mubr.msk.bf16.vlgmr.msra.gmra.mrb[0].mxu1 %vm638_vm2, %v1823_v25  ;;  %v874_v34 = vsel %vm638_vm2, %v869_v31, 0 }
 0x2a1   : > { %1547 = vmatpush3.bf16.xpose.msra.mxu1 %v762_v30  ;;  %1548 = vmatprep.mubr.msk.bf16.mxu1 %vm1677_vm1, %v1676_v8 }
 0x2a2   : > { %1558 = vmatprep.subr.bf16.mxu1 %v1676_v8 }
 0x2a3   : > { %v867_v33 = vpop.permute.xlu1 %866 }
 0x2a7   : > { %v981_v35 = vpop.permute.xlu1 %980 }
 0x2a8   : > { %1549 = vmatmul.mubr.msk.bf16.vlgmr.msra.gmra.mrb[4].mxu1 %vm638_vm2, %v755_v32  ;;  %v986_v36 = vsel %vm638_vm2, %v981_v35, 0 }
 0x2a9   : > { %1559 = vmatpush3.bf16.xpose.msra.mxu1 %v874_v34  ;;  %1560 = vmatprep.mubr.msk.bf16.mxu1 %vm1677_vm1, %v1676_v8 }
 0x2aa   : > { %1570 = vmatprep.subr.bf16.mxu1 %v1676_v8 }
 0x2ab   : > { %v979_v37 = vpop.permute.xlu1 %978 }
 0x2b0   : > { %1561 = vmatmul.mubr.msk.bf16.vlgmr.msra.gmra.mrb[8].mxu1 %vm638_vm2, %v867_v33 }
 0x2b1   : > { %1571 = vmatpush3.bf16.xpose.msra.mxu1 %v986_v36  ;;  %1572 = vmatprep.mubr.msk.bf16.mxu1 %vm1677_vm1, %v1676_v8 }
 0x2b2   : > { %1582 = vmatprep.subr.bf16.mxu1 %v1676_v8 }
 0x2b8   : > { %1573 = vmatmul.mubr.msk.bf16.vlgmr.msra.gmra.mrb[12].mxu1 %vm638_vm2, %v979_v37 }
 0x2b9   : > { %1586 = vmatprep.mubr.msk.bf16.mxu1 %vm1677_vm1, %v1676_v8 }
 0x373   : > { %v679_v45 = vpop.f32.mrb[0].mxu1 }
 0x374   : > { %v685_v46 = vmul.f32 0.35355338, %v679_v45  ;;  %v1538_v47 = vpop.f32.mrb[1].mxu1 }
 0x375   : > { %v682_v48 = vpop.f32.mrb[2].mxu1 }
 0x376   : > { %v1539_v49 = vpop.f32.mrb[3].mxu1  ;;  %v692_v50 = vadd.f32 %v690_v44, %v685_v46 }
 0x378   : > { %v693_v51 = vsel %vm638_vm2, %v692_v50, -inf }
 0x379   : > { %694 = vmax.xlane.f32.xlu1 %v693_v51 }
 0x37b   : > { %v798_v52 = vpop.f32.mrb[4].mxu1 }
 0x37c   : > { %v804_v53 = vmul.f32 0.35355338, %v798_v52  ;;  %v1550_v54 = vpop.f32.mrb[5].mxu1 }
 0x37d   : > { %v801_v55 = vpop.f32.mrb[6].mxu1 }
 0x37e   : > { %v1551_v56 = vpop.f32.mrb[7].mxu1  ;;  %v805_v57 = vadd.f32 %v804_v53, %v690_v44 }
 0x380   : > { %v806_v58 = vsel %vm638_vm2, %v805_v57, -inf }
 0x381   : > { %807 = vmax.xlane.f32.xlu0 %v806_v58 }
 0x383   : > { %v910_v59 = vpop.f32.mrb[8].mxu1 }
 0x384   : > { %v916_v60 = vmul.f32 0.35355338, %v910_v59  ;;  %v1562_v61 = vpop.f32.mrb[9].mxu1 }
 0x385   : > { %v913_v62 = vpop.f32.mrb[10].mxu1 }
 0x386   : > { %v1563_v63 = vpop.f32.mrb[11].mxu1  ;;  %v917_v0 = vadd.f32 %v916_v60, %v690_v44 }
 0x387   : > { %v1636_v63 = vld [vmem:[%s1963_s6] sm:$0xff]  }
 0x388   : > { %v918_v1 = vsel %vm638_vm2, %v917_v0, -inf  ;;  %1583 = vmatpush3.bf16.msra.mxu1 %v1636_v63 }
 0x389   : > { %919 = vmax.xlane.f32.xlu1 %v918_v1  ;;  %1584 = vmatprep.subr.bf16.mxu1 %v1676_v8 }
 0x38b   : > { %v1022_v2 = vpop.f32.mrb[12].mxu1 }
 0x38c   : > { %v1028_v3 = vmul.f32 0.35355338, %v1022_v2  ;;  %v1574_v4 = vpop.f32.mrb[13].mxu1 }
 0x38d   : > { %v1025_v5 = vpop.f32.mrb[14].mxu1 }
 0x38e   : > { %v1575_v6 = vpop.f32.mrb[15].mxu1  ;;  %v1029_v7 = vadd.f32 %v1028_v3, %v690_v44 }
 0x390   : > { %v1030_v9 = vsel %vm638_vm2, %v1029_v7, -inf }
 0x391   : > { %1031 = vmax.xlane.f32.xlu0 %v1030_v9 }
 0x406   : > { %v695_v10 = vpop.xlane.xlu1 %694 }
 0x407   : > { %v696_v11 = vsub.f32 %v692_v50, %v695_v10 }
 0x409   : > { %v697_v12 = vmul.f32 1.442695, %v696_v11 }
 0x40b   : > { %1646 = vpow2.f32 %v697_v12 }
 0x40e   : > { %v808_v13 = vpop.xlane.xlu0 %807 }
 0x40f   : > { %v809_v14 = vsub.f32 %v805_v57, %v808_v13 }
 0x411   : > { %v810_v15 = vmul.f32 1.442695, %v809_v14 }
 0x413   : > { %1648 = vpow2.f32 %v810_v15 }
 0x415   : > { %v1647_v16 = vpop.eup %1646 }
 0x416   : > { %v699_v17 = vsel %vm638_vm2, %v1647_v16, 0.0  ;;  %v920_v27 = vpop.xlane.xlu1 %919 }
 0x417   : > { %700 = vadd.xlane.f32.xlu1 %v699_v17  ;;  %v921_v28 = vsub.f32 %v917_v0, %v920_v27  ;;  %v1637_v0 = vld [vmem:[%s1963_s6 + $0x8] sm:$0xff]   ;;  %v1476_v17 = vld [vmem:[%s1964_s7] ss:$0 sm:$0xff] }
 0x418   : > { %1585 = vmatpush3.bf16.msra.mxu1 %v1637_v0 }
 0x419   : > { %v922_v29 = vmul.f32 1.442695, %v921_v28  ;;  %1598 = vmatprep.subr.bf16.mxu1 %v1676_v8 }
 0x41d   : > { %v1649_v19 = vpop.eup %1648 }
 0x41e   : > { %v1032_v20 = vpop.xlane.xlu0 %1031  ;;  %v812_v21 = vsel %vm638_vm2, %v1649_v19, 0.0 }
 0x41f   : > { %v1033_v22 = vsub.f32 %v1029_v7, %v1032_v20  ;;  %813 = vadd.xlane.f32.xlu0 %v812_v21 }
 0x421   : > { %v1034_v23 = vmul.f32 1.442695, %v1033_v22 }
 0x423   : > { %1650 = vpow2.f32 %v1034_v23 }
 0x424   : > { %1652 = vpow2.f32 %v922_v29 }
 0x428   : > { %705 = vrot.lane.b32.xlu1 %v1823_v25, %s1685_s20 }
 0x42d   : > { %v1651_v24 = vpop.eup %1650 }
 0x42e   : > { %v1036_v26 = vsel %vm638_vm2, %v1651_v24, 0.0  ;;  %v1653_v30 = vpop.eup %1652 }
 0x42f   : > { %1037 = vadd.xlane.f32.xlu0 %v1036_v26  ;;  %v924_v31 = vsel %vm638_vm2, %v1653_v30, 0.0 }
 0x445   : > { %818 = vrot.lane.b32.xlu0 %v1823_v25, %s1686_s23  ;;  %s530_s23 = scalar_lea.vmem %s1973_s16, %s1461_s18 }
 0x44c   : > { %925 = vadd.xlane.f32.xlu1 %v924_v31 }
 0x45d   : > { %930 = vrot.lane.b32.xlu1 %v1823_v25, %s1687_s24 }
 0x461   : > { %1042 = vrot.lane.b32.xlu1 %v1823_v25, %s1688_s25 }
 0x4a4   : > { %v701_v32 = vpop.xlane.xlu1 %700 }
 0x4a5   : > { %1654 = vrcp.f32 %v701_v32  ;;  %v1638_v32 = vld [vmem:[%s1967_s10] sm:$0xff]  }
 0x4a8   : > { %v706_v33 = vpop.permute.xlu1 %705 }
 0x4a9   : > { %v712_v34 = vsel %vm710_vm3, %v706_v33, 0  ;;  %v1639_v33 = vld [vmem:[%s1967_s10 + $0x8] sm:$0xff]  }
 0x4aa   : > { %1541 = vmatpush3.bf16.msra.mxu0 %v712_v34 }
 0x4ab   : > { %1552 = vmatprep.subr.bf16.mxu0 %v1676_v8 }
 0x4ac   : > { %v814_v36 = vpop.xlane.xlu0 %813 }
 0x4ad   : > { %1656 = vrcp.f32 %v814_v36 }
 0x4af   : > { %v1655_v35 = vpop.eup %1654 }
 0x4b0   : > { %v703_v37 = vmul.f32 %v1655_v35, %v1647_v16 }
 0x4b2   : > { %v704_v38 = vpack.c.bf16 %v703_v37, %v703_v37  ;;  %v1480_v37 = vld [vmem:[%s1965_s8] ss:$0 sm:$0xff] }
 0x4b4   : > { %1543 = vmatmul.mubr.msk.bf16.vlgmr.msra.gmra.mrb[4].mxu0 %vm638_vm2, %v704_v38 }
 0x4b5   : > { %1554 = vmatprep.mubr.msk.bf16.mxu0 %vm1677_vm1, %v1676_v8 }
 0x4b7   : > { %v1657_v25 = vpop.eup %1656 }
 0x4b8   : > { %v816_v40 = vmul.f32 %v1657_v25, %v1649_v19  ;;  %v1481_v25 = vld [vmem:[%s1966_s9] ss:$0 sm:$0xff] }
 0x4ba   : > { %v817_v43 = vpack.c.bf16 %v816_v40, %v816_v40 }
 0x4bc   : > { %v1038_v39 = vpop.xlane.xlu0 %1037 }
 0x4c0   : > { %v819_v41 = vpop.permute.xlu0 %818 }
 0x4c1   : > { %v824_v42 = vsel %vm710_vm3, %v819_v41, 0 }
 0x4c2   : > { %1553 = vmatpush3.bf16.msra.mxu0 %v824_v42  ;;  %v1640_v42 = vld [vmem:[%s1969_s12] sm:$0xff]  }
 0x4c3   : > { %1564 = vmatprep.subr.bf16.mxu0 %v1676_v8 }
 0x4c5   : > { %1555 = vmatmul.mubr.msk.bf16.vlgmr.msra.gmra.mrb[8].mxu0 %vm638_vm2, %v817_v43  ;;  %v1641_v43 = vld [vmem:[%s1969_s12 + $0x8] sm:$0xff]  }
 0x4c6   : > { %1566 = vmatprep.mubr.msk.bf16.mxu0 %vm1677_vm1, %v1676_v8 }
 0x4d9   : > { %v926_v44 = vpop.xlane.xlu1 %925 }
 0x4da   : > { %1658 = vrcp.f32 %v926_v44  ;;  %v1642_v44 = vld [vmem:[%s1969_s12 + $0x10] sm:$0xff]  }
 0x4db   : > { %1660 = vrcp.f32 %v1038_v39 }
 0x4dd   : > { %v931_v45 = vpop.permute.xlu1 %930 }
 0x4de   : > { %v936_v46 = vsel %vm710_vm3, %v931_v45, 0  ;;  %v1643_v45 = vld [vmem:[%s1969_s12 + $0x18] sm:$0xff]  }
 0x4df   : > { %1565 = vmatpush3.bf16.msra.mxu0 %v936_v46  ;;  %v1482_v46 = vld [vmem:[%s1968_s11] ss:$0 sm:$0xff] }
 0x4e0   : > { %1576 = vmatprep.subr.bf16.mxu0 %v1676_v8 }
 0x4e1   : > { %v1043_v49 = vpop.permute.xlu1 %1042 }
 0x4e2   : > { %v1048_v52 = vsel %vm710_vm3, %v1043_v49, 0 }
 0x4e4   : > { %v1659_v47 = vpop.eup %1658 }
 0x4e5   : > { %v928_v48 = vmul.f32 %v1659_v47, %v1653_v30  ;;  %v1661_v51 = vpop.eup %1660 }
 0x4e6   : > { %v1040_v53 = vmul.f32 %v1661_v51, %v1651_v24 }
 0x4e7   : > { %v929_v50 = vpack.c.bf16 %v928_v48, %v928_v48 }
 0x4e8   : > { %v1041_v54 = vpack.c.bf16 %v1040_v53, %v1040_v53 }
 0x4e9   : > { %1567 = vmatmul.mubr.msk.bf16.vlgmr.msra.gmra.mrb[12].mxu0 %vm638_vm2, %v929_v50 }
 0x4ea   : > { %1577 = vmatpush3.bf16.msra.mxu0 %v1048_v52  ;;  %1578 = vmatprep.mubr.msk.bf16.mxu0 %vm1677_vm1, %v1676_v8 }
 0x4eb   : > { %1590 = vmatprep.subr.bf16.mxu0 %v1676_v8 }
 0x4f1   : > { %1579 = vmatmul.mubr.msk.bf16.vlgmr.msra.gmra.mrb[16].mxu0 %vm638_vm2, %v1041_v54 }
 0x4f2   : > { %1594 = vmatprep.mubr.msk.bf16.mxu0 %vm1677_vm1, %v1676_v8  ;;  %1591 = vmatpush3.bf16.msra.mxu0 %v1638_v32 }
 0x4f3   : > { %1592 = vmatprep.subr.bf16.mxu0 %v1676_v8 }
 0x4f6   : > { %1593 = vmatpush3.bf16.msra.mxu0 %v1639_v33 }
 0x587   : > { %v748_v55 = vpop.f32.mrb[4].mxu0 }
 0x588   : > { %v1544_v56 = vpop.f32.mrb[5].mxu0 }
 0x589   : > { %v751_v57 = vpop.f32.mrb[6].mxu0 }
 0x58a   : > { %v1545_v58 = vpop.f32.mrb[7].mxu0  ;;  %v1486_v57 = vld [vmem:[%s1970_s13] ss:$0 sm:$0xff] }
 0x598   : > { %v860_v59 = vpop.f32.mrb[8].mxu0 }
 0x599   : > { %1091 = vrot.lane.b32.xlu0 %v860_v59, %s1689_s26  ;;  %v1556_v60 = vpop.f32.mrb[9].mxu0 }
 0x59a   : > { %v863_v61 = vpop.f32.mrb[10].mxu0 }
 0x59b   : > { %v1557_v62 = vpop.f32.mrb[11].mxu0 }
 0x5bc   : > { %v972_v1 = vpop.f32.mrb[12].mxu0 }
 0x5bd   : > { %1095 = vrot.lane.b32.xlu1 %v972_v1, %s1690_s0  ;;  %v1568_v2 = vpop.f32.mrb[13].mxu0 }
 0x5be   : > { %v975_v3 = vpop.f32.mrb[14].mxu0 }
 0x5bf   : > { %v1569_v4 = vpop.f32.mrb[15].mxu0 }
 0x5c4   : > { %v1084_v5 = vpop.f32.mrb[16].mxu0 }
 0x5c5   : > { %1099 = vrot.lane.b32.xlu0 %v1084_v5, %s1691_s17  ;;  %v1580_v6 = vpop.f32.mrb[17].mxu0 }
 0x5c6   : > { %v1087_v7 = vpop.f32.mrb[18].mxu0 }
 0x5c7   : > { %v1581_v9 = vpop.f32.mrb[19].mxu0 }
 0x60b   : > { %v1092_v10 = vpop.permute.xlu0 %1091 }
 0x60c   : > { %v1102_v12 = vsel %vm638_vm2, %v748_v55, %v1092_v10 }
 0x62f   : > { %v1096_v11 = vpop.permute.xlu1 %1095 }
 0x630   : > { %v1104_v13 = vsel %vm1103_vm4, %v1102_v12, %v1096_v11  ;;  %v1492_v11 = vld [vmem:[%s1971_s14] ss:$0 sm:$0xff] }
 0x637   : > { %v1100_v14 = vpop.permute.xlu0 %1099 }
 0x638   : > { %v1106_v15 = vsel %vm1105_vm5, %v1104_v13, %v1100_v14  ;;  %v1493_v13 = vld [vmem:[%s1972_s15] ss:$0 sm:$0xff] }
 0x639   : > { %v1107_v16 = vpack.c.bf16 %v1106_v15, %v1106_v15 }
 0x63b   : > { %1587 = vmatmul.mubr.msk.bf16.vlgmr.msra.gmra.mrb[16].mxu1 %vm535_vm0, %v1107_v16 }
 0x63c   : > { %1606 = vmatprep.mubr.msk.bf16.mxu1 %vm1677_vm1, %v1676_v8  ;;  %1599 = vmatpush3.bf16.msra.mxu1 %v1640_v42 }
 0x63d   : > { %1600 = vmatprep.subr.bf16.mxu1 %v1676_v8 }
 0x640   : > { %1601 = vmatpush3.bf16.msra.mxu1 %v1641_v43 }
 0x641   : > { %1602 = vmatprep.subr.bf16.mxu1 %v1676_v8 }
 0x644   : > { %1603 = vmatpush3.bf16.msra.mxu1 %v1642_v44 }
 0x645   : > { %1604 = vmatprep.subr.bf16.mxu1 %v1676_v8 }
 0x648   : > { %1605 = vmatpush3.bf16.msra.mxu1 %v1643_v45 }
 0x70e   : > { %v1168_v19 = vpop.f32.mrb[16].mxu1 }
 0x70f   : > { %v1169_v20 = vadd.f32 %v1476_v17, %v1168_v19  ;;  %v1588_v21 = vpop.f32.mrb[17].mxu1 }
 0x710   : > { %v1171_v22 = vpop.f32.mrb[18].mxu1 }
 0x711   : > { %v1589_v23 = vpop.f32.mrb[19].mxu1  ;;  %v1174_v24 = vadd.f32 %v1169_v20, %v1813_v18 }
 0x713   : > { %v1177_v26 = vsel %vm535_vm0, %v1174_v24, 0.0 }
 0x714   : > { %1178 = vadd.xlane.f32.xlu1 %v1177_v26 }
 0x7a1   : > { %v1179_v27 = vpop.xlane.xlu1 %1178 }
 0x7a2   : > { %v1180_v28 = vmul.f32 0.03125, %v1179_v27 }
 0x7a4   : > { %v1181_v29 = vsub.f32 %v1174_v24, %v1180_v28 }
 0x7a6   : > { %v1182_v30 = vmul.f32 %v1181_v29, %v1181_v29 }
 0x7a8   : > { %v1183_v31 = vsel %vm535_vm0, %v1182_v30, 0.0 }
 0x7a9   : > { %1184 = vadd.xlane.f32.xlu0 %v1183_v31 }
 0x836   : > { %v1185_v18 = vpop.xlane.xlu0 %1184 }
 0x837   : > { %v1186_v34 = vmul.f32 0.03125, %v1185_v18 }
 0x839   : > { %v1187_v35 = vadd.f32 1e-12, %v1186_v34 }
 0x83b   : > { %1662 = vrsqrt.f32 %v1187_v35 }
 0x845   : > { %v1663_v36 = vpop.eup %1662 }
 0x846   : > { %v1189_v38 = vmul.f32 %v1663_v36, %v1181_v29 }
 0x848   : > { %v1196_v39 = vmul.f32 %v1480_v37, %v1189_v38 }
 0x84a   : > { %v1203_v40 = vadd.f32 %v1481_v25, %v1196_v39 }
 0x84c   : > { %v1204_v41 = vpack.c.bf16 %v1203_v40, %v1203_v40 }
 0x84e   : > { %1595 = vmatmul.mubr.msk.bf16.vlgmr.msra.gmra.mrb[20].mxu0 %vm535_vm0, %v1204_v41 }
 0x921   : > { %v1265_v47 = vpop.f32.mrb[20].mxu0 }
 0x922   : > { %v1266_v48 = vadd.f32 %v1482_v46, %v1265_v47  ;;  %v1596_v49 = vpop.f32.mrb[21].mxu0 }
 0x923   : > { %v1268_v50 = vpop.f32.mrb[22].mxu0 }
 0x924   : > { %v1272_v51 = vmul.f32 0.70710677, %v1266_v48  ;;  %v1597_v52 = vpop.f32.mrb[23].mxu0  ;;  %v1271_v54 = vmul.f32 0.5, %v1266_v48 }
 0x926   : > { %1664 = verf.f32 %v1272_v51 }
 0x930   : > { %v1665_v53 = vpop.eup %1664 }
 0x931   : > { %v1274_v55 = vadd.f32 1.0, %v1665_v53 }
 0x933   : > { %v1275_v8 = vmul.f32 %v1274_v55, %v1271_v54 }
 0x935   : > { %v1276_v56 = vpack.c.bf16 %v1275_v8, %v1275_v8 }
 0x937   : > { %1607 = vmatmul.mubr.msk.bf16.vlgmr.msra.gmra.mrb[20].mxu1 %vm1316_vm6, %v1276_v56 }
 0xa0a   : > { %v1354_v58 = vpop.f32.mrb[20].mxu1 }
 0xa0b   : > { %v1355_v59 = vadd.f32 %v1486_v57, %v1354_v58  ;;  %v1608_v60 = vpop.f32.mrb[21].mxu1 }
 0xa0c   : > { %v1357_v61 = vpop.f32.mrb[22].mxu1 }
 0xa0d   : > { %v1609_v62 = vpop.f32.mrb[23].mxu1  ;;  %v1360_v63 = vadd.f32 %v1355_v59, %v1203_v40 }
 0xa0f   : > { %v1363_v0 = vsel %vm535_vm0, %v1360_v63, 0.0 }
 0xa10   : > { %1364 = vadd.xlane.f32.xlu0 %v1363_v0 }
 0xa9d   : > { %v1365_v1 = vpop.xlane.xlu0 %1364 }
 0xa9e   : > { %v1366_v2 = vmul.f32 0.03125, %v1365_v1 }
 0xaa0   : > { %v1367_v3 = vsub.f32 %v1360_v63, %v1366_v2 }
 0xaa2   : > { %v1368_v4 = vmul.f32 %v1367_v3, %v1367_v3 }
 0xaa4   : > { %v1369_v5 = vsel %vm535_vm0, %v1368_v4, 0.0 }
 0xaa5   : > { %1370 = vadd.xlane.f32.xlu1 %v1369_v5 }
 0xb32   : > { %v1371_v6 = vpop.xlane.xlu1 %1370 }
 0xb33   : > { %v1372_v7 = vmul.f32 0.03125, %v1371_v6 }
 0xb35   : > { %v1373_v9 = vadd.f32 1e-12, %v1372_v7 }
 0xb37   : > { %1666 = vrsqrt.f32 %v1373_v9 }
 0xb41   : > { %v1667_v10 = vpop.eup %1666 }
 0xb42   : > { %v1375_v12 = vmul.f32 %v1667_v10, %v1367_v3 }
 0xb44   : > { %v1382_v14 = vmul.f32 %v1492_v11, %v1375_v12 }
 0xb46   : > { %v1389_v15 = vadd.f32 %v1493_v13, %v1382_v14 }
 0xb48   : > { %v1390_v16 = vpack.c.bf16 %v1389_v15, %v1389_v15 }
 0xb4a   : > { %1392 = vst.msk [vmem:[%s530_s23] sm:$0xf] %vm1391_vm7, %v1390_v16 }
 0xb4b PF: > { %s26_s21 = sadd.s32 1, %s1674_s21  }
 0xb4c   : > { %p23_p4 = scmp.ge.s32.totalorder %s26_s21, 4  }
 0xb4e   :  { %25 = sbr.rel (!%p23_p4) target bundleno = 2 (0x2), region = 117 }

// kernel: bert_forward.4
= control target key start
LH: loop header
LB: loop body
LE: loop exit
PB: predicated region body
PF: predicated region fallthrough
CT: control target
= control target key end

     0   :  { %s1744_s19 = smov 0   ;;  %s1918_s0 = inlined_call_operand.vmem [shape: bf16[2,8,32], index: 0, kind: input, shape index: {}]   ;;  %s1919_s1 = inlined_call_operand.vmem [shape: f32[2,1,8], index: 1, kind: input, shape index: {}]   ;;  %s1920_s2 = inlined_call_operand.vmem [shape: f32[1,32], index: 2, kind: input, shape index: {}]   ;;  %s1921_s3 = inlined_call_operand.vmem [shape: f32[1,32], index: 3, kind: input, shape index: {}]   ;;  %s1922_s4 = inlined_call_operand.vmem [shape: bf16[32,96], index: 4, kind: input, shape index: {}]   ;;  %s1923_s5 = inlined_call_operand.vmem [shape: f32[1,96], index: 5, kind: input, shape index: {}]   ;;  %s1924_s6 = inlined_call_operand.vmem [shape: bf16[32,32], index: 6, kind: input, shape index: {}]   ;;  %s1925_s7 = inlined_call_operand.vmem [shape: f32[1,32], index: 7, kind: input, shape index: {}]   ;;  %s1926_s8 = inlined_call_operand.vmem [shape: f32[1,32], index: 8, kind: input, shape index: {}]   ;;  %s1927_s9 = inlined_call_operand.vmem [shape: f32[1,32], index: 9, kind: input, shape index: {}]   ;;  %s1928_s10 = inlined_call_operand.vmem [shape: bf16[32,64], index: 10, kind: input, shape index: {}]   ;;  %s1929_s11 = inlined_call_operand.vmem [shape: f32[1,64], index: 11, kind: input, shape index: {}]   ;;  %s1930_s12 = inlined_call_operand.vmem [shape: bf16[64,32], index: 12, kind: input, shape index: {}]   ;;  %s1931_s13 = inlined_call_operand.vmem [shape: f32[1,32], index: 13, kind: input, shape index: {}]   ;;  %s1932_s14 = inlined_call_operand.vmem [shape: f32[1,32], index: 14, kind: input, shape index: {}]   ;;  %s1933_s15 = inlined_call_operand.vmem [shape: f32[1,32], index: 15, kind: input, shape index: {}]   ;;  %s1934_s16 = inlined_call_operand.vmem [shape: bf16[2,8,32], index: 16, kind: output, shape index: {}]  }
   0x1   :  { %1935 = sst [smem:[#allocation2_spill]] %s1918_s0 }
   0x2 LB: > { %s1426_s20 = sadd.s32 4294967295, %s1641_s19   ;;  %p1430_p0 = scmp.ge.s32.totalorder %s1641_s19, 1  ;;  %s1641_s19 = sphi %s1744_s19, %s26_s19  }
   0x3   : > { %p469_p1 = scmp.lt.s32.totalorder %s1641_s19, 3 }
   0x5   : > { %p470_p2 = pnand %p1430_p0, %p469_p1 }
   0x6   : > { %v1603_v0 = vld [vmem:[%s1922_s4] sm:$0xff] (!%p470_p2)   ;;  %v1643_v1 = vmov (!%p470_p2), 0.0   ;;  %v1604_v2 = vld [vmem:[%s1922_s4 + $0x8] sm:$0xff] (!%p470_p2)   ;;  %vm1644_vm0 = vmmov (!%p470_p2), 0   ;;  %p520_p3 = scmp.lt.s32.totalorder (!%p470_p2), %s1426_s20, 1  ;;  %vm560_vm1 = vcmask (!%p470_p2), 261120   ;;  %v657_v22 = vlaneseq (!%p470_p2) }
   0x7   : > { %473 = sbr.rel (%p470_p2) target bundleno = 2577 (0xa11), region = 84  ;;  %1495 = vmatprep.subr.bf16.mxu0 (!%p470_p2), %v1643_v1  ;;  %1503 = vmatprep.subr.bf16.mxu1 (!%p470_p2), %v1643_v1  ;;  %s1936_s26 = sld [smem:[#allocation2_spill]] (!%p470_p2)  ;;  %v1433_v4 = vld [vmem:[%s1923_s5] ss:$0 sm:$0xff] (!%p470_p2)  ;;  %vm608_vm2 = vcmask (!%p470_p2), 64512   ;;  %vm680_vm3 = vcmask (!%p470_p2), 1043456  }
   0x8   : > { %1496 = vmatpush3.bf16.msra.mxu0 (!%p470_p2), %v1603_v0  ;;  %1499 = vmatprep.mubr.msk.bf16.mxu0 (!%p470_p2), %vm1644_vm0, %v1643_v1  ;;  %s1645_s29 = smov (!%p470_p2), 120   ;;  %s1646_s30 = smov (!%p470_p2), 96   ;;  %v658_v25 = vshrl.u32 (!%p470_p2), %v657_v22, 7  ;;  %vm1073_vm4 = vcmask (!%p470_p2), 130048   ;;  %vm1075_vm5 = vcmask (!%p470_p2), 195584   ;;  %vm1287_vm6 = vcmask (!%p470_p2), 523264  }
   0x9   : > { %1497 = vmatprep.subr.bf16.mxu0 (!%p470_p2), %v1643_v1  ;;  %1505 = vmatprep.mubr.msk.bf16.mxu1 (!%p470_p2), %vm1644_vm0, %v1643_v1  ;;  %s1647_s17 = smov (!%p470_p2), 80   ;;  %s1648_s18 = smov (!%p470_p2), 88   ;;  %vm1362_vm7 = vcmask (!%p470_p2), 257024  }
   0xa   : > { %s1649_s2 = smov (!%p470_p2), 72   ;;  %s1650_s21 = smov (!%p470_p2), 112   ;;  %v659_v27 = vsub.s32 (!%p470_p2), 0, %v658_v25 }
   0xb   : > { %s1651_s3 = smov (!%p470_p2), 104   ;;  %s1654_s28 = smov (!%p470_p2), 40  }
   0xc   : > { %1498 = vmatpush3.bf16.msra.mxu0 (!%p470_p2), %v1604_v2  ;;  %s1655_s0 = smov (!%p470_p2), 48  }
   0xd   : > { %1509 = vmatprep.subr.bf16.mxu0 (!%p470_p2), %v1643_v1 }
   0xe   : > { %s1938_s20 = smov (!%p520_p3, %s1426_s20), 1 }
   0xf   : > { %s1431_s23 = sshll.u32 %s1938_s20, 2  ;;  %s526_s25 = scalar_lea.vmem %s1919_s1, %s1938_s20 }
  0x10   : > { %s523_s27 = scalar_lea.vmem %s1936_s26, %s1431_s23  ;;  %v534_v23 = vld [vmem:[%s526_s25] sm:$0x1]  ;;  %s1652_s26 = smov 56  }
  0x11   : > { %v1774_v3 = vld [vmem:[%s523_s27] sm:$0xf]  ;;  %v535_v24 = vsub.f32 1.0, %v534_v23  ;;  %s1653_s27 = smov 64   ;;  %s530_s22 = scalar_lea.vmem %s1934_s16, %s1431_s23 }
  0x12   : > { %1500 = vmatmul.mubr.msk.bf16.vlgmr.msra.gmra.mrb[0].mxu0 %vm560_vm1, %v1774_v3 }
  0x13   : > { %1511 = vmatprep.mubr.msk.bf16.mxu0 %vm1644_vm0, %v1643_v1  ;;  %v536_v26 = vmul.f32 -1e+09, %v535_v24 }
  0x15   : > { %v660_v28 = vrot.slane %v536_v26, %v659_v27 }
  0xe5   : > { %v598_v5 = vpop.f32.mrb[0].mxu0 }
  0xe6   : > { %v599_v6 = vadd.f32 %v1433_v4, %v598_v5  ;;  %v1501_v7 = vpop.f32.mrb[1].mxu0 }
  0xe7   : > { %v601_v8 = vpop.f32.mrb[2].mxu0 }
  0xe8   : > { %v1783_v9 = vpack.c.bf16 %v599_v6, %v599_v6  ;;  %v1502_v10 = vpop.f32.mrb[3].mxu0 }
  0xea   : > { %724 = vrot.lane.b32.xlu1 %v1783_v9, %s1645_s29  ;;  %606 = vrot.lane.b32.xlu0 %v1783_v9, %s1646_s30  ;;  %s1656_s29 = smov 8  }
  0xee   : > { %838 = vrot.lane.b32.xlu1 %v1783_v9, %s1647_s17  ;;  %726 = vrot.lane.b32.xlu0 %v1783_v9, %s1648_s18 }
  0xf2   : > { %950 = vrot.lane.b32.xlu1 %v1783_v9, %s1649_s2  ;;  %836 = vrot.lane.b32.xlu0 %v1783_v9, %s1650_s21  ;;  %s1657_s21 = smov 16  }
  0xf6   : > { %948 = vrot.lane.b32.xlu0 %v1783_v9, %s1651_s3  ;;  %s1658_s3 = smov 24  }
 0x15c   : > { %v607_v11 = vpop.permute.xlu0 %606  ;;  %v725_v14 = vpop.permute.xlu1 %724 }
 0x15d   : > { %v613_v12 = vsel %vm608_vm2, %v607_v11, 0 }
 0x15e   : > { %1504 = vmatpush3.bf16.xpose.msra.mxu1 %v613_v12 }
 0x15f   : > { %1515 = vmatprep.subr.bf16.mxu1 %v1643_v1 }
 0x160   : > { %v727_v13 = vpop.permute.xlu0 %726  ;;  %v839_v16 = vpop.permute.xlu1 %838 }
 0x161   : > { %v732_v15 = vsel %vm608_vm2, %v727_v13, 0  ;;  %v844_v17 = vsel %vm608_vm2, %v839_v16, 0 }
 0x164   : > { %v951_v18 = vpop.permute.xlu1 %950  ;;  %v837_v19 = vpop.permute.xlu0 %836 }
 0x165   : > { %1506 = vmatmul.mubr.msk.bf16.vlgmr.msra.gmra.mrb[0].mxu1 %vm608_vm2, %v1783_v9  ;;  %v956_v20 = vsel %vm608_vm2, %v951_v18, 0 }
 0x166   : > { %1516 = vmatpush3.bf16.xpose.msra.mxu1 %v732_v15  ;;  %1517 = vmatprep.mubr.msk.bf16.mxu1 %vm1644_vm0, %v1643_v1 }
 0x167   : > { %1527 = vmatprep.subr.bf16.mxu1 %v1643_v1 }
 0x168   : > { %v949_v21 = vpop.permute.xlu0 %948 }
 0x16d   : > { %1518 = vmatmul.mubr.msk.bf16.vlgmr.msra.gmra.mrb[4].mxu1 %vm608_vm2, %v725_v14 }
 0x16e   : > { %1528 = vmatpush3.bf16.xpose.msra.mxu1 %v844_v17  ;;  %1529 = vmatprep.mubr.msk.bf16.mxu1 %vm1644_vm0, %v1643_v1 }
 0x16f   : > { %1539 = vmatprep.subr.bf16.mxu1 %v1643_v1 }
 0x175   : > { %1530 = vmatmul.mubr.msk.bf16.vlgmr.msra.gmra.mrb[8].mxu1 %vm608_vm2, %v837_v19 }
 0x176   : > { %1540 = vmatpush3.bf16.xpose.msra.mxu1 %v956_v20  ;;  %1541 = vmatprep.mubr.msk.bf16.mxu1 %vm1644_vm0, %v1643_v1 }
 0x177   : > { %1551 = vmatprep.subr.bf16.mxu1 %v1643_v1 }
 0x17d   : > { %1542 = vmatmul.mubr.msk.bf16.vlgmr.msra.gmra.mrb[12].mxu1 %vm608_vm2, %v949_v21 }
 0x17e   : > { %1555 = vmatprep.mubr.msk.bf16.mxu1 %vm1644_vm0, %v1643_v1 }
 0x238   : > { %v649_v29 = vpop.f32.mrb[0].mxu1 }
 0x239   : > { %v655_v30 = vmul.f32 0.35355338, %v649_v29  ;;  %v1507_v31 = vpop.f32.mrb[1].mxu1 }
 0x23a   : > { %v652_v32 = vpop.f32.mrb[2].mxu1 }
 0x23b   : > { %v1508_v33 = vpop.f32.mrb[3].mxu1  ;;  %v662_v34 = vadd.f32 %v660_v28, %v655_v30 }
 0x23d   : > { %v663_v35 = vsel %vm608_vm2, %v662_v34, -inf }
 0x23e   : > { %664 = vmax.xlane.f32.xlu1 %v663_v35 }
 0x240   : > { %v768_v36 = vpop.f32.mrb[4].mxu1 }
 0x241   : > { %v774_v37 = vmul.f32 0.35355338, %v768_v36  ;;  %v1519_v38 = vpop.f32.mrb[5].mxu1 }
 0x242   : > { %v771_v39 = vpop.f32.mrb[6].mxu1 }
 0x243   : > { %v1520_v40 = vpop.f32.mrb[7].mxu1  ;;  %v775_v41 = vadd.f32 %v774_v37, %v660_v28 }
 0x245   : > { %v776_v42 = vsel %vm608_vm2, %v775_v41, -inf }
 0x246   : > { %777 = vmax.xlane.f32.xlu0 %v776_v42 }
 0x248   : > { %v880_v43 = vpop.f32.mrb[8].mxu1 }
 0x249   : > { %v886_v44 = vmul.f32 0.35355338, %v880_v43  ;;  %v1531_v45 = vpop.f32.mrb[9].mxu1 }
 0x24a   : > { %v883_v46 = vpop.f32.mrb[10].mxu1 }
 0x24b   : > { %v1532_v47 = vpop.f32.mrb[11].mxu1  ;;  %v887_v48 = vadd.f32 %v886_v44, %v660_v28 }
 0x24c   : > { %v1605_v47 = vld [vmem:[%s1924_s6] sm:$0xff]  }
 0x24d   : > { %v888_v49 = vsel %vm608_vm2, %v887_v48, -inf  ;;  %1552 = vmatpush3.bf16.msra.mxu1 %v1605_v47 }
 0x24e   : > { %889 = vmax.xlane.f32.xlu0 %v888_v49  ;;  %1553 = vmatprep.subr.bf16.mxu1 %v1643_v1 }
 0x250   : > { %v992_v50 = vpop.f32.mrb[12].mxu1 }
 0x251   : > { %v998_v51 = vmul.f32 0.35355338, %v992_v50  ;;  %v1543_v52 = vpop.f32.mrb[13].mxu1 }
 0x252   : > { %v995_v53 = vpop.f32.mrb[14].mxu1 }
 0x253   : > { %v1544_v54 = vpop.f32.mrb[15].mxu1  ;;  %v999_v55 = vadd.f32 %v998_v51, %v660_v28 }
 0x255   : > { %v1000_v56 = vsel %vm608_vm2, %v999_v55, -inf }
 0x256   : > { %1001 = vmax.xlane.f32.xlu1 %v1000_v56 }
 0x2cb   : > { %v665_v57 = vpop.xlane.xlu1 %664 }
 0x2cc   : > { %v666_v58 = vsub.f32 %v662_v34, %v665_v57 }
 0x2ce   : > { %v667_v59 = vmul.f32 1.442695, %v666_v58 }
 0x2d0   : > { %1613 = vpow2.f32 %v667_v59 }
 0x2d3   : > { %v778_v60 = vpop.xlane.xlu0 %777 }
 0x2d4   : > { %v779_v61 = vsub.f32 %v775_v41, %v778_v60 }
 0x2d6   : > { %v780_v62 = vmul.f32 1.442695, %v779_v61 }
 0x2d8   : > { %1615 = vpow2.f32 %v780_v62 }
 0x2da   : > { %v1614_v63 = vpop.eup %1613 }
 0x2db   : > { %v890_v0 = vpop.xlane.xlu0 %889  ;;  %v669_v2 = vsel %vm608_vm2, %v1614_v63, 0.0 }
 0x2dc   : > { %v891_v4 = vsub.f32 %v887_v48, %v890_v0  ;;  %670 = vadd.xlane.f32.xlu0 %v669_v2  ;;  %v1606_v48 = vld [vmem:[%s1924_s6 + $0x8] sm:$0xff]   ;;  %v1445_v0 = vld [vmem:[%s1925_s7] ss:$0 sm:$0xff]  ;;  %v533_v2 = vunpack.c.l.bf16 %v1774_v3 }
 0x2dd   : > { %1554 = vmatpush3.bf16.msra.mxu1 %v1606_v48  ;;  %v1607_v3 = vld [vmem:[%s1928_s10] sm:$0xff]  }
 0x2de   : > { %v892_v5 = vmul.f32 1.442695, %v891_v4  ;;  %1567 = vmatprep.subr.bf16.mxu1 %v1643_v1 }
 0x2e0   : > { %1617 = vpow2.f32 %v892_v5 }
 0x2e2   : > { %v1616_v6 = vpop.eup %1615 }
 0x2e3   : > { %v782_v7 = vsel %vm608_vm2, %v1616_v6, 0.0  ;;  %v1002_v11 = vpop.xlane.xlu1 %1001 }
 0x2e4   : > { %783 = vadd.xlane.f32.xlu1 %v782_v7  ;;  %v1003_v12 = vsub.f32 %v999_v55, %v1002_v11 }
 0x2e6   : > { %v1004_v13 = vmul.f32 1.442695, %v1003_v12 }
 0x2e8   : > { %1619 = vpow2.f32 %v1004_v13 }
 0x2ea   : > { %v1618_v8 = vpop.eup %1617 }
 0x2eb   : > { %v894_v10 = vsel %vm608_vm2, %v1618_v8, 0.0 }
 0x2ec   : > { %895 = vadd.xlane.f32.xlu0 %v894_v10 }
 0x2f2   : > { %v1620_v14 = vpop.eup %1619 }
 0x2f3   : > { %v1006_v15 = vsel %vm608_vm2, %v1620_v14, 0.0 }
 0x2f5   : > { %788 = vrot.lane.b32.xlu1 %v1783_v9, %s1652_s26 }
 0x302   : > { %675 = vrot.lane.b32.xlu0 %v1783_v9, %s1653_s27 }
 0x306   : > { %1012 = vrot.lane.b32.xlu0 %v1783_v9, %s1654_s28 }
 0x319   : > { %1007 = vadd.xlane.f32.xlu1 %v1006_v15 }
 0x32a   : > { %900 = vrot.lane.b32.xlu1 %v1783_v9, %s1655_s0 }
 0x369   : > { %v671_v16 = vpop.xlane.xlu0 %670 }
 0x36a   : > { %1621 = vrcp.f32 %v671_v16 }
 0x371   : > { %v784_v17 = vpop.xlane.xlu1 %783 }
 0x372   : > { %1623 = vrcp.f32 %v784_v17  ;;  %v1608_v17 = vld [vmem:[%s1928_s10 + $0x8] sm:$0xff]  }
 0x374   : > { %v1622_v18 = vpop.eup %1621 }
 0x375   : > { %v673_v20 = vmul.f32 %v1622_v18, %v1614_v63  ;;  %v789_v23 = vpop.permute.xlu1 %788 }
 0x376   : > { %v794_v26 = vsel %vm680_vm3, %v789_v23, 0 }
 0x377   : > { %v674_v24 = vpack.c.bf16 %v673_v20, %v673_v20 }
 0x379   : > { %v896_v19 = vpop.xlane.xlu0 %895 }
 0x37a   : > { %1625 = vrcp.f32 %v896_v19 }
 0x37c   : > { %v1624_v25 = vpop.eup %1623 }
 0x37d   : > { %v676_v21 = vpop.permute.xlu0 %675  ;;  %v786_v9 = vmul.f32 %v1624_v25, %v1616_v6 }
 0x37e   : > { %v682_v22 = vsel %vm680_vm3, %v676_v21, 0 }
 0x37f   : > { %1510 = vmatpush3.bf16.msra.mxu0 %v682_v22  ;;  %v787_v27 = vpack.c.bf16 %v786_v9, %v786_v9  ;;  %v1449_v22 = vld [vmem:[%s1926_s8] ss:$0 sm:$0xff] }
 0x380   : > { %1521 = vmatprep.subr.bf16.mxu0 %v1643_v1 }
 0x381   : > { %v1013_v33 = vpop.permute.xlu0 %1012 }
 0x382   : > { %1512 = vmatmul.mubr.msk.bf16.vlgmr.msra.gmra.mrb[4].mxu0 %vm608_vm2, %v674_v24  ;;  %v1018_v35 = vsel %vm680_vm3, %v1013_v33, 0  ;;  %v1450_v24 = vld [vmem:[%s1927_s9] ss:$0 sm:$0xff] }
 0x383   : > { %1522 = vmatpush3.bf16.msra.mxu0 %v794_v26  ;;  %1523 = vmatprep.mubr.msk.bf16.mxu0 %vm1644_vm0, %v1643_v1 }
 0x384   : > { %1533 = vmatprep.subr.bf16.mxu0 %v1643_v1  ;;  %v1626_v28 = vpop.eup %1625 }
 0x385   : > { %v898_v30 = vmul.f32 %v1626_v28, %v1618_v8  ;;  %v1610_v28 = vld [vmem:[%s1930_s12 + $0x8] sm:$0xff]  }
 0x387   : > { %v899_v34 = vpack.c.bf16 %v898_v30, %v898_v30  ;;  %v1612_v30 = vld [vmem:[%s1930_s12 + $0x18] sm:$0xff]  }
 0x38a   : > { %1524 = vmatmul.mubr.msk.bf16.vlgmr.msra.gmra.mrb[8].mxu0 %vm608_vm2, %v787_v27  ;;  %v1609_v27 = vld [vmem:[%s1930_s12] sm:$0xff]  }
 0x38b   : > { %1535 = vmatprep.mubr.msk.bf16.mxu0 %vm1644_vm0, %v1643_v1 }
 0x3a6   : > { %v1008_v29 = vpop.xlane.xlu1 %1007 }
 0x3a7   : > { %1627 = vrcp.f32 %v1008_v29  ;;  %v1611_v29 = vld [vmem:[%s1930_s12 + $0x10] sm:$0xff]  }
 0x3aa   : > { %v901_v31 = vpop.permute.xlu1 %900 }
 0x3ab   : > { %v906_v32 = vsel %vm680_vm3, %v901_v31, 0  ;;  %v1451_v31 = vld [vmem:[%s1929_s11] ss:$0 sm:$0xff] }
 0x3ac   : > { %1534 = vmatpush3.bf16.msra.mxu0 %v906_v32 }
 0x3ad   : > { %1545 = vmatprep.subr.bf16.mxu0 %v1643_v1 }
 0x3af   : > { %1536 = vmatmul.mubr.msk.bf16.vlgmr.msra.gmra.mrb[12].mxu0 %vm608_vm2, %v899_v34 }
 0x3b0   : > { %1546 = vmatpush3.bf16.msra.mxu0 %v1018_v35  ;;  %1547 = vmatprep.mubr.msk.bf16.mxu0 %vm1644_vm0, %v1643_v1 }
 0x3b1   : > { %v1628_v36 = vpop.eup %1627  ;;  %1559 = vmatprep.subr.bf16.mxu0 %v1643_v1 }
 0x3b2   : > { %v1010_v37 = vmul.f32 %v1628_v36, %v1620_v14 }
 0x3b4   : > { %v1011_v38 = vpack.c.bf16 %v1010_v37, %v1010_v37 }
 0x3b7   : > { %1548 = vmatmul.mubr.msk.bf16.vlgmr.msra.gmra.mrb[16].mxu0 %vm608_vm2, %v1011_v38 }
 0x3b8   : > { %1563 = vmatprep.mubr.msk.bf16.mxu0 %vm1644_vm0, %v1643_v1  ;;  %1560 = vmatpush3.bf16.msra.mxu0 %v1607_v3 }
 0x3b9   : > { %1561 = vmatprep.subr.bf16.mxu0 %v1643_v1 }
 0x3bc   : > { %1562 = vmatpush3.bf16.msra.mxu0 %v1608_v17 }
 0x455   : > { %v718_v39 = vpop.f32.mrb[4].mxu0 }
 0x456   : > { %v1513_v40 = vpop.f32.mrb[5].mxu0 }
 0x457   : > { %v721_v41 = vpop.f32.mrb[6].mxu0 }
 0x458   : > { %v1514_v42 = vpop.f32.mrb[7].mxu0 }
 0x459   : > { %v1455_v42 = vld [vmem:[%s1931_s13] ss:$0 sm:$0xff] }
 0x45d   : > { %v830_v43 = vpop.f32.mrb[8].mxu0 }
 0x45e   : > { %1061 = vrot.lane.b32.xlu1 %v830_v43, %s1656_s29  ;;  %v1525_v44 = vpop.f32.mrb[9].mxu0 }
 0x45f   : > { %v833_v45 = vpop.f32.mrb[10].mxu0 }
 0x460   : > { %v1526_v46 = vpop.f32.mrb[11].mxu0 }
 0x482   : > { %v942_v49 = vpop.f32.mrb[12].mxu0 }
 0x483   : > { %1065 = vrot.lane.b32.xlu0 %v942_v49, %s1657_s21  ;;  %v1537_v50 = vpop.f32.mrb[13].mxu0 }
 0x484   : > { %v945_v51 = vpop.f32.mrb[14].mxu0 }
 0x485   : > { %v1538_v52 = vpop.f32.mrb[15].mxu0 }
 0x48a   : > { %v1054_v53 = vpop.f32.mrb[16].mxu0 }
 0x48b   : > { %1069 = vrot.lane.b32.xlu1 %v1054_v53, %s1658_s3  ;;  %v1549_v54 = vpop.f32.mrb[17].mxu0 }
 0x48c   : > { %v1057_v55 = vpop.f32.mrb[18].mxu0 }
 0x48d   : > { %v1550_v56 = vpop.f32.mrb[19].mxu0 }
 0x4d0   : > { %v1062_v57 = vpop.permute.xlu1 %1061 }
 0x4d1   : > { %v1072_v59 = vsel %vm608_vm2, %v718_v39, %v1062_v57 }
 0x4f5   : > { %v1066_v58 = vpop.permute.xlu0 %1065 }
 0x4f6   : > { %v1074_v60 = vsel %vm1073_vm4, %v1072_v59, %v1066_v58  ;;  %v1461_v59 = vld [vmem:[%s1932_s14] ss:$0 sm:$0xff] }
 0x4fd   : > { %v1070_v61 = vpop.permute.xlu1 %1069 }
 0x4fe   : > { %v1076_v62 = vsel %vm1075_vm5, %v1074_v60, %v1070_v61  ;;  %v1462_v61 = vld [vmem:[%s1933_s15] ss:$0 sm:$0xff] }
 0x4ff   : > { %v1077_v63 = vpack.c.bf16 %v1076_v62, %v1076_v62 }
 0x501   : > { %1556 = vmatmul.mubr.msk.bf16.vlgmr.msra.gmra.mrb[16].mxu1 %vm560_vm1, %v1077_v63 }
 0x502   : > { %1575 = vmatprep.mubr.msk.bf16.mxu1 %vm1644_vm0, %v1643_v1  ;;  %1568 = vmatpush3.bf16.msra.mxu1 %v1609_v27 }
 0x503   : > { %1569 = vmatprep.subr.bf16.mxu1 %v1643_v1 }
 0x506   : > { %1570 = vmatpush3.bf16.msra.mxu1 %v1610_v28 }
 0x507   : > { %1571 = vmatprep.subr.bf16.mxu1 %v1643_v1 }
 0x50a   : > { %1572 = vmatpush3.bf16.msra.mxu1 %v1611_v29 }
 0x50b   : > { %1573 = vmatprep.subr.bf16.mxu1 %v1643_v1 }
 0x50e   : > { %1574 = vmatpush3.bf16.msra.mxu1 %v1612_v30 }
 0x5d4   : > { %v1138_v4 = vpop.f32.mrb[16].mxu1 }
 0x5d5   : > { %v1139_v5 = vadd.f32 %v1445_v0, %v1138_v4  ;;  %v1557_v6 = vpop.f32.mrb[17].mxu1 }
 0x5d6   : > { %v1141_v7 = vpop.f32.mrb[18].mxu1 }
 0x5d7   : > { %v1558_v8 = vpop.f32.mrb[19].mxu1  ;;  %v1144_v10 = vadd.f32 %v1139_v5, %v533_v2 }
 0x5d9   : > { %v1147_v11 = vsel %vm560_vm1, %v1144_v10, 0.0 }
 0x5da   : > { %1148 = vadd.xlane.f32.xlu0 %v1147_v11 }
 0x667   : > { %v1149_v12 = vpop.xlane.xlu0 %1148 }
 0x668   : > { %v1151_v13 = vmul.f32 0.03125, %v1149_v12 }
 0x66a   : > { %v1152_v14 = vsub.f32 %v1144_v10, %v1151_v13 }
 0x66c   : > { %v1153_v15 = vmul.f32 %v1152_v14, %v1152_v14 }
 0x66e   : > { %v1154_v16 = vsel %vm560_vm1, %v1153_v15, 0.0 }
 0x66f   : > { %1155 = vadd.xlane.f32.xlu1 %v1154_v16 }
 0x6fc   : > { %v1156_v18 = vpop.xlane.xlu1 %1155 }
 0x6fd   : > { %v1157_v19 = vmul.f32 0.03125, %v1156_v18 }
 0x6ff   : > { %v1158_v20 = vadd.f32 1e-12, %v1157_v19 }
 0x701   : > { %1629 = vrsqrt.f32 %v1158_v20 }
 0x70b   : > { %v1630_v21 = vpop.eup %1629 }
 0x70c   : > { %v1160_v23 = vmul.f32 %v1630_v21, %v1152_v14 }
 0x70e   : > { %v1167_v25 = vmul.f32 %v1449_v22, %v1160_v23 }
 0x710   : > { %v1174_v26 = vadd.f32 %v1450_v24, %v1167_v25 }
 0x712   : > { %v1175_v9 = vpack.c.bf16 %v1174_v26, %v1174_v26 }
 0x714   : > { %1564 = vmatmul.mubr.msk.bf16.vlgmr.msra.gmra.mrb[20].mxu0 %vm560_vm1, %v1175_v9 }
 0x7e7   : > { %v1236_v32 = vpop.f32.mrb[20].mxu0 }
 0x7e8   : > { %v1237_v33 = vadd.f32 %v1451_v31, %v1236_v32  ;;  %v1565_v34 = vpop.f32.mrb[21].mxu0 }
 0x7e9   : > { %v1239_v35 = vpop.f32.mrb[22].mxu0 }
 0x7ea   : > { %v1243_v36 = vmul.f32 0.70710677, %v1237_v33  ;;  %v1566_v37 = vpop.f32.mrb[23].mxu0  ;;  %v1242_v39 = vmul.f32 0.5, %v1237_v33 }
 0x7ec   : > { %1631 = verf.f32 %v1243_v36 }
 0x7f6   : > { %v1632_v38 = vpop.eup %1631 }
 0x7f7   : > { %v1245_v40 = vadd.f32 1.0, %v1632_v38 }
 0x7f9   : > { %v1246_v1 = vmul.f32 %v1245_v40, %v1242_v39 }
 0x7fb   : > { %v1247_v41 = vpack.c.bf16 %v1246_v1, %v1246_v1 }
 0x7fd   : > { %1576 = vmatmul.mubr.msk.bf16.vlgmr.msra.gmra.mrb[20].mxu1 %vm1287_vm6, %v1247_v41 }
 0x8d0   : > { %v1325_v43 = vpop.f32.mrb[20].mxu1 }
 0x8d1   : > { %v1326_v44 = vadd.f32 %v1455_v42, %v1325_v43  ;;  %v1577_v45 = vpop.f32.mrb[21].mxu1 }
 0x8d2   : > { %v1328_v46 = vpop.f32.mrb[22].mxu1 }
 0x8d3   : > { %v1578_v47 = vpop.f32.mrb[23].mxu1  ;;  %v1331_v48 = vadd.f32 %v1326_v44, %v1174_v26 }
 0x8d5   : > { %v1334_v49 = vsel %vm560_vm1, %v1331_v48, 0.0 }
 0x8d6   : > { %1335 = vadd.xlane.f32.xlu0 %v1334_v49 }
 0x963   : > { %v1336_v50 = vpop.xlane.xlu0 %1335 }
 0x964   : > { %v1337_v51 = vmul.f32 0.03125, %v1336_v50 }
 0x966   : > { %v1338_v52 = vsub.f32 %v1331_v48, %v1337_v51 }
 0x968   : > { %v1339_v53 = vmul.f32 %v1338_v52, %v1338_v52 }
 0x96a   : > { %v1340_v54 = vsel %vm560_vm1, %v1339_v53, 0.0 }
 0x96b   : > { %1341 = vadd.xlane.f32.xlu0 %v1340_v54 }
 0x9f8   : > { %v1342_v55 = vpop.xlane.xlu0 %1341 }
 0x9f9   : > { %v1343_v56 = vmul.f32 0.03125, %v1342_v55 }
 0x9fb   : > { %v1344_v57 = vadd.f32 1e-12, %v1343_v56 }
 0x9fd   : > { %1633 = vrsqrt.f32 %v1344_v57 }
 0xa07   : > { %v1634_v58 = vpop.eup %1633 }
 0xa08   : > { %v1346_v60 = vmul.f32 %v1634_v58, %v1338_v52 }
 0xa0a   : > { %v1353_v62 = vmul.f32 %v1461_v59, %v1346_v60 }
 0xa0c   : > { %v1360_v63 = vadd.f32 %v1462_v61, %v1353_v62 }
 0xa0e   : > { %v1361_v0 = vpack.c.bf16 %v1360_v63, %v1360_v63 }
 0xa10   : > { %1363 = vst.msk [vmem:[%s530_s22] sm:$0xf] %vm1362_vm7, %v1361_v0 }
 0xa11 PF: > { %s26_s19 = sadd.s32 1, %s1641_s19  }
 0xa12   : > { %p23_p4 = scmp.ge.s32.totalorder %s26_s19, 4  }
 0xa14   :  { %25 = sbr.rel (!%p23_p4) target bundleno = 2 (0x2), region = 117 }

</bundles_post_ra>
